<compile_context>
chip_gen: v7x
topology: tpu7x:2x2x1
jax: 0.10.0
libtpu: 0.0.40
codegen_flags: <defaults>
</compile_context>

<pallas_src>
import math

import jax
import jax.numpy as jnp
from jax.experimental import pallas as pl
from jax.experimental.pallas import tpu as pltpu

# ---------------- model dims (small, consistent with the module) ----------------
B = 2        # batch
S = 8        # sequence length
D = 32       # d_model
NH = 4       # num heads
DH = D // NH # head dim
FF = 64      # feed-forward hidden
MH = 16      # mlp hidden
EPS = 1e-5   # LayerNorm eps (PyTorch default)

# ---------------- packed-parameter layout ----------------
# Weight slab: (WROWS, NWCOL), zero-padded rows for weights with < WROWS input dim.
WROWS = max(D, FF, MH)                 # 64
CQ, CK, CV, CO = 0, D, 2 * D, 3 * D    # (D, D) each
C1 = 4 * D                             # w1: (D, FF)
C2 = C1 + FF                           # w2: (FF, D)
CM1 = C2 + D                           # wm1: (D, MH)
NWCOL = CM1 + MH                       # 240

# Bias slab: single (1, NBCOL) row.
BQ, BK, BV, BO = 0, D, 2 * D, 3 * D
BG1, BH1 = 4 * D, 5 * D                # layernorm1 weight / bias
BF1 = 6 * D                            # b1: (FF,)
BF2 = BF1 + FF                         # b2: (D,)
BG2, BH2 = BF2 + D, BF2 + 2 * D        # layernorm2 weight / bias
BM1 = BH2 + D                          # bm1: (MH,)
BW2 = BM1 + MH                         # wm2 stored as a row: (MH,)
BC2 = BW2 + MH                         # bm2: scalar
NBCOL = BC2 + 1                        # 385


# ---------------------------- Pallas kernel ----------------------------
def combined_kernel(x_ref, w_ref, b_ref, o_ref):
    xf = x_ref[...]                                   # (B*S, D) -- all examples at once
    scale = 1.0 / math.sqrt(DH)

    def layer_norm(y, g, b):
        mu = jnp.mean(y, axis=-1, keepdims=True)
        yc = y - mu
        var = jnp.mean(yc * yc, axis=-1, keepdims=True)
        return yc * jax.lax.rsqrt(var + EPS) * g + b

    # ---- fused QKV projections over all B*S rows: (16,32) @ (32,32) ----
    q = jnp.dot(xf, w_ref[0:D, CQ:CQ + D], preferred_element_type=jnp.float32) + b_ref[:, BQ:BQ + D]
    k = jnp.dot(xf, w_ref[0:D, CK:CK + D], preferred_element_type=jnp.float32) + b_ref[:, BK:BK + D]
    v = jnp.dot(xf, w_ref[0:D, CV:CV + D], preferred_element_type=jnp.float32) + b_ref[:, BV:BV + D]

    q3 = q.reshape(B, S, D)
    k3 = k.reshape(B, S, D)
    v3 = v.reshape(B, S, D)

    # ---- attention core: per head, batched over the batch dim ----
    ctx_heads = []
    for h in range(NH):
        sl = slice(h * DH, (h + 1) * DH)
        s = jnp.einsum('bqd,bkd->bqk', q3[:, :, sl], k3[:, :, sl],
                       preferred_element_type=jnp.float32) * scale          # (B, S, S)
        s = s - jnp.max(s, axis=-1, keepdims=True)
        p = jnp.exp(s)
        p = p * pl.reciprocal(jnp.sum(p, axis=-1, keepdims=True), approx=True)
        ctx_heads.append(jnp.einsum('bqk,bkd->bqd', p, v3[:, :, sl],
                                    preferred_element_type=jnp.float32))    # (B, S, DH)
    ctx = jnp.concatenate(ctx_heads, axis=-1).reshape(B * S, D)             # (B*S, D)

    # ---- single fused output projection ----
    attn = jnp.dot(ctx, w_ref[0:D, CO:CO + D],
                   preferred_element_type=jnp.float32) + b_ref[:, BO:BO + D]

    # ---- post-LN residual 1 ----
    h1 = layer_norm(xf + attn, b_ref[:, BG1:BG1 + D], b_ref[:, BH1:BH1 + D])

    # ---- feed-forward over all rows ----
    ff = jnp.dot(h1, w_ref[0:D, C1:C1 + FF],
                 preferred_element_type=jnp.float32) + b_ref[:, BF1:BF1 + FF]
    ff = jnp.maximum(ff, 0.0)
    ff = jnp.dot(ff, w_ref[0:FF, C2:C2 + D],
                 preferred_element_type=jnp.float32) + b_ref[:, BF2:BF2 + D]

    # ---- post-LN residual 2 ----
    h2 = layer_norm(h1 + ff, b_ref[:, BG2:BG2 + D], b_ref[:, BH2:BH2 + D])

    # ---- mean pool over sequence (dim=1) ----
    pooled = jnp.mean(h2.reshape(B, S, D), axis=1)                          # (B, D)

    # ---- MLP head ----
    m = jnp.dot(pooled, w_ref[0:D, CM1:CM1 + MH],
                preferred_element_type=jnp.float32) + b_ref[:, BM1:BM1 + MH]
    m = jnp.maximum(m, 0.0)                                                 # (B, MH)

    # final (MH -> 1) projection emitted directly as a lane-oriented (1, B) row
    wm2_row = b_ref[:, BW2:BW2 + MH]                                        # (1, MH)
    out_row = jax.lax.dot_general(wm2_row, m, (((1,), (1,)), ((), ())),
                                  preferred_element_type=jnp.float32)       # (1, B)
    o_ref[...] = out_row + b_ref[:, BC2:BC2 + 1]


# ---------------------------- wrapper ----------------------------
def combined_forward(x, wslab, bslab):
    b, s, d = x.shape
    assert (b, s, d) == (B, S, D)
    x2 = x.reshape(b * s, d)                          # flatten batch & seq for fused matmuls
    out = pl.pallas_call(
        combined_kernel,
        out_shape=jax.ShapeDtypeStruct((1, b), jnp.float32),
        grid_spec=pltpu.PrefetchScalarGridSpec(
            num_scalar_prefetch=0,
            grid=(1,),                                # single invocation: no per-step overhead
            in_specs=[pl.BlockSpec((b * s, d), lambda i: (0, 0)),
                      pl.BlockSpec((WROWS, NWCOL), lambda i: (0, 0)),
                      pl.BlockSpec((1, NBCOL), lambda i: (0, 0))],
            out_specs=pl.BlockSpec((1, b), lambda i: (0, 0)),
        ),
        compiler_params=pltpu.CompilerParams(dimension_semantics=("arbitrary",)),
    )(x2, wslab, bslab)
    return out[0]                                     # (B,)  == .squeeze(-1)


# ---------------------------- params ----------------------------
def init_params(key):
    ks = jax.random.split(key, 16)
    n = lambda k, shape, sc=0.1: (sc * jax.random.normal(k, shape)).astype(jnp.float32)
    wq = n(ks[0], (D, D));   bq = n(ks[1], (D,), 0.01)
    wk = n(ks[2], (D, D));   bk = n(ks[3], (D,), 0.01)
    wv = n(ks[4], (D, D));   bv = n(ks[5], (D,), 0.01)
    wo = n(ks[6], (D, D));   bo = n(ks[7], (D,), 0.01)
    g1 = jnp.ones((D,), jnp.float32); be1 = jnp.zeros((D,), jnp.float32)
    w1 = n(ks[8], (D, FF));  b1 = n(ks[9], (FF,), 0.01)
    w2 = n(ks[10], (FF, D)); b2 = n(ks[11], (D,), 0.01)
    g2 = jnp.ones((D,), jnp.float32); be2 = jnp.zeros((D,), jnp.float32)
    wm1 = n(ks[12], (D, MH)); bm1 = n(ks[13], (MH,), 0.01)
    wm2 = n(ks[14], (MH,));   bm2 = (0.01 * jax.random.normal(ks[15], ())).astype(jnp.float32)
    return (wq, bq, wk, bk, wv, bv, wo, bo, g1, be1,
            w1, b1, w2, b2, g2, be2, wm1, bm1, wm2, bm2)


def pack_params(params):
    (wq, bq, wk, bk, wv, bv, wo, bo, g1, be1,
     w1, b1, w2, b2, g2, be2, wm1, bm1, wm2, bm2) = params

    wslab = jnp.zeros((WROWS, NWCOL), jnp.float32)
    wslab = wslab.at[:D, CQ:CQ + D].set(wq)
    wslab = wslab.at[:D, CK:CK + D].set(wk)
    wslab = wslab.at[:D, CV:CV + D].set(wv)
    wslab = wslab.at[:D, CO:CO + D].set(wo)
    wslab = wslab.at[:D, C1:C1 + FF].set(w1)
    wslab = wslab.at[:FF, C2:C2 + D].set(w2)
    wslab = wslab.at[:D, CM1:CM1 + MH].set(wm1)

    brow = jnp.concatenate([bq, bk, bv, bo, g1, be1, b1, b2, g2, be2,
                            bm1, wm2, jnp.reshape(bm2, (1,))]).astype(jnp.float32)
    bslab = brow.reshape(1, NBCOL)
    return wslab, bslab


# ---------------------------- pure-JAX reference ----------------------------
def reference_forward(x, params):
    (wq, bq, wk, bk, wv, bv, wo, bo, g1, be1,
     w1, b1, w2, b2, g2, be2, wm1, bm1, wm2, bm2) = params

    def ln(y, g, b):
        mu = jnp.mean(y, axis=-1, keepdims=True)
        var = jnp.mean((y - mu) ** 2, axis=-1, keepdims=True)
        return (y - mu) / jnp.sqrt(var + EPS) * g + b

    outs = []
    for i in range(x.shape[0]):
        xi = x[i]                                     # (S, D)
        q = xi @ wq + bq
        k = xi @ wk + bk
        v = xi @ wv + bv
        heads = []
        for h in range(NH):
            sl = slice(h * DH, (h + 1) * DH)
            s = (q[:, sl] @ k[:, sl].T) / math.sqrt(DH)
            p = jax.nn.softmax(s, axis=-1)
            heads.append(p @ v[:, sl])
        attn = jnp.concatenate(heads, axis=-1) @ wo + bo
        h1 = ln(xi + attn, g1, be1)
        ff = jnp.maximum(h1 @ w1 + b1, 0.0) @ w2 + b2
        h2 = ln(h1 + ff, g2, be2)
        pooled = jnp.mean(h2, axis=0)
        m = jnp.maximum(pooled @ wm1 + bm1, 0.0)
        outs.append(jnp.dot(m, wm2) + bm2)
    return jnp.stack(outs)


# ---------------------------- main ----------------------------
if __name__ == "__main__":
    key = jax.random.PRNGKey(0)
    kx, kp = jax.random.split(key)
    x = jax.random.normal(kx, (B, S, D), dtype=jnp.float32)
    params = init_params(kp)
    wslab, bslab = pack_params(params)

    out = combined_forward(x, wslab, bslab)
    out = jax.block_until_ready(out)

    ref = reference_forward(x, params)
    assert out.shape == (B,), out.shape
    # tolerance covers the approximate (EUP) reciprocal used in the in-kernel softmax
    assert jnp.allclose(out, ref, atol=2e-3, rtol=2e-3), (out, ref)
    print("KERNEL_OK")
</pallas_src>

<mosaic_0001>
module attributes {stable_mosaic.version = 11 : i64} {
  func.func @combined_kernel(%arg0: i32, %arg1: memref<16x32xf32, #tpu.memory_space<vmem>>, %arg2: memref<64x240xf32, #tpu.memory_space<vmem>>, %arg3: memref<1x385xf32, #tpu.memory_space<vmem>>, %arg4: memref<1x2xf32, #tpu.memory_space<vmem>>) attributes {dimension_semantics = [#tpu.dimension_semantics<arbitrary>], iteration_bounds = array<i64: 1>, scalar_prefetch = 0 : i64, scratch_operands = 0 : i64, tpu.core_type = #tpu.core_type<tc>, window_params = [{pipeline_mode = #tpu.pipeline_mode<synchronous>, transform_indices = @transform_0, window_bounds = array<i64: 16, 32>}, {pipeline_mode = #tpu.pipeline_mode<synchronous>, transform_indices = @transform_1, window_bounds = array<i64: 64, 240>}, {pipeline_mode = #tpu.pipeline_mode<synchronous>, transform_indices = @transform_2, window_bounds = array<i64: 1, 385>}, {pipeline_mode = #tpu.pipeline_mode<synchronous>, transform_indices = @transform_3, window_bounds = array<i64: 1, 2>}]} {
    %c0 = arith.constant 0 : index
    %c0_0 = arith.constant 0 : index
    %0 = vector.load %arg1[%c0, %c0_0] : memref<16x32xf32, #tpu.memory_space<vmem>>, vector<16x32xf32>
    %c0_1 = arith.constant 0 : index
    %c0_2 = arith.constant 0 : index
    %1 = vector.load %arg2[%c0_1, %c0_2] : memref<64x240xf32, #tpu.memory_space<vmem>>, vector<32x32xf32>
    %cst = arith.constant dense<0.000000e+00> : vector<16x32xf32>
    %2 = tpu.matmul %0, %1, %cst {dimension_numbers = #tpu.dot_dimension_numbers<[1], [0], [0], [1], [0, 0, 1, 1], [], []>} : vector<16x32xf32>, vector<32x32xf32>, vector<16x32xf32> -> vector<16x32xf32>
    %c0_3 = arith.constant 0 : index
    %c0_4 = arith.constant 0 : index
    %3 = vector.load %arg3[%c0_3, %c0_4] : memref<1x385xf32, #tpu.memory_space<vmem>>, vector<1x32xf32>
    %4 = vector.broadcast %3 : vector<1x32xf32> to vector<16x32xf32>
    %5 = arith.addf %2, %4 : vector<16x32xf32>
    %c0_5 = arith.constant 0 : index
    %c32 = arith.constant 32 : index
    %6 = vector.load %arg2[%c0_5, %c32] : memref<64x240xf32, #tpu.memory_space<vmem>>, vector<32x32xf32>
    %cst_6 = arith.constant dense<0.000000e+00> : vector<16x32xf32>
    %7 = tpu.matmul %0, %6, %cst_6 {dimension_numbers = #tpu.dot_dimension_numbers<[1], [0], [0], [1], [0, 0, 1, 1], [], []>} : vector<16x32xf32>, vector<32x32xf32>, vector<16x32xf32> -> vector<16x32xf32>
    %c0_7 = arith.constant 0 : index
    %c32_8 = arith.constant 32 : index
    %8 = vector.load %arg3[%c0_7, %c32_8] : memref<1x385xf32, #tpu.memory_space<vmem>>, vector<1x32xf32>
    %9 = vector.broadcast %8 : vector<1x32xf32> to vector<16x32xf32>
    %10 = arith.addf %7, %9 : vector<16x32xf32>
    %c0_9 = arith.constant 0 : index
    %c64 = arith.constant 64 : index
    %11 = vector.load %arg2[%c0_9, %c64] : memref<64x240xf32, #tpu.memory_space<vmem>>, vector<32x32xf32>
    %cst_10 = arith.constant dense<0.000000e+00> : vector<16x32xf32>
    %12 = tpu.matmul %0, %11, %cst_10 {dimension_numbers = #tpu.dot_dimension_numbers<[1], [0], [0], [1], [0, 0, 1, 1], [], []>} : vector<16x32xf32>, vector<32x32xf32>, vector<16x32xf32> -> vector<16x32xf32>
    %c0_11 = arith.constant 0 : index
    %c64_12 = arith.constant 64 : index
    %13 = vector.load %arg3[%c0_11, %c64_12] : memref<1x385xf32, #tpu.memory_space<vmem>>, vector<1x32xf32>
    %14 = vector.broadcast %13 : vector<1x32xf32> to vector<16x32xf32>
    %15 = arith.addf %12, %14 : vector<16x32xf32>
    %16 = vector.shape_cast %5 : vector<16x32xf32> to vector<2x8x32xf32>
    %17 = vector.shape_cast %10 : vector<16x32xf32> to vector<2x8x32xf32>
    %18 = vector.shape_cast %15 : vector<16x32xf32> to vector<2x8x32xf32>
    %19 = vector.extract_strided_slice %16 {offsets = [0, 0, 0], sizes = [2, 8, 8], strides = [1, 1, 1]} : vector<2x8x32xf32> to vector<2x8x8xf32>
    %20 = vector.extract_strided_slice %17 {offsets = [0, 0, 0], sizes = [2, 8, 8], strides = [1, 1, 1]} : vector<2x8x32xf32> to vector<2x8x8xf32>
    "tpu.trace_start"() <{level = 10 : i32, message = "bqd,bkd->bqk"}> : () -> ()
    %cst_13 = arith.constant dense<0.000000e+00> : vector<2x8x8xf32>
    %21 = tpu.matmul %19, %20, %cst_13 {dimension_numbers = #tpu.dot_dimension_numbers<[2], [2], [1], [1], [0, 0, 0, 1, 1, 1], [0], [0]>} : vector<2x8x8xf32>, vector<2x8x8xf32>, vector<2x8x8xf32> -> vector<2x8x8xf32>
    "tpu.trace_stop"() : () -> ()
    %cst_14 = arith.constant 0.353553385 : f32
    %22 = vector.broadcast %cst_14 : f32 to vector<2x8x8xf32>
    %23 = arith.mulf %21, %22 : vector<2x8x8xf32>
    %cst_15 = arith.constant dense<0xFF800000> : vector<2x8xf32>
    %24 = vector.multi_reduction <maximumf>, %23, %cst_15 [2] : vector<2x8x8xf32> to vector<2x8xf32>
    %25 = vector.shape_cast %24 : vector<2x8xf32> to vector<2x8x1xf32>
    %26 = vector.broadcast %25 : vector<2x8x1xf32> to vector<2x8x8xf32>
    %27 = arith.subf %23, %26 : vector<2x8x8xf32>
    %28 = math.exp %27 : vector<2x8x8xf32>
    %cst_16 = arith.constant dense<0.000000e+00> : vector<2x8xf32>
    %29 = vector.multi_reduction <add>, %28, %cst_16 [2] : vector<2x8x8xf32> to vector<2x8xf32>
    %30 = vector.shape_cast %29 : vector<2x8xf32> to vector<2x8x1xf32>
    %31 = tpu.reciprocal %30 {approx = true} : vector<2x8x1xf32> -> vector<2x8x1xf32>
    %32 = vector.broadcast %31 : vector<2x8x1xf32> to vector<2x8x8xf32>
    %33 = arith.mulf %28, %32 : vector<2x8x8xf32>
    %34 = vector.extract_strided_slice %18 {offsets = [0, 0, 0], sizes = [2, 8, 8], strides = [1, 1, 1]} : vector<2x8x32xf32> to vector<2x8x8xf32>
    "tpu.trace_start"() <{level = 10 : i32, message = "bqk,bkd->bqd"}> : () -> ()
    %cst_17 = arith.constant dense<0.000000e+00> : vector<2x8x8xf32>
    %35 = tpu.matmul %33, %34, %cst_17 {dimension_numbers = #tpu.dot_dimension_numbers<[2], [1], [1], [2], [0, 0, 0, 1, 1, 2], [0], [0]>} : vector<2x8x8xf32>, vector<2x8x8xf32>, vector<2x8x8xf32> -> vector<2x8x8xf32>
    "tpu.trace_stop"() : () -> ()
    %36 = vector.extract_strided_slice %16 {offsets = [0, 0, 8], sizes = [2, 8, 8], strides = [1, 1, 1]} : vector<2x8x32xf32> to vector<2x8x8xf32>
    %37 = vector.extract_strided_slice %17 {offsets = [0, 0, 8], sizes = [2, 8, 8], strides = [1, 1, 1]} : vector<2x8x32xf32> to vector<2x8x8xf32>
    "tpu.trace_start"() <{level = 10 : i32, message = "bqd,bkd->bqk"}> : () -> ()
    %cst_18 = arith.constant dense<0.000000e+00> : vector<2x8x8xf32>
    %38 = tpu.matmul %36, %37, %cst_18 {dimension_numbers = #tpu.dot_dimension_numbers<[2], [2], [1], [1], [0, 0, 0, 1, 1, 1], [0], [0]>} : vector<2x8x8xf32>, vector<2x8x8xf32>, vector<2x8x8xf32> -> vector<2x8x8xf32>
    "tpu.trace_stop"() : () -> ()
    %cst_19 = arith.constant 0.353553385 : f32
    %39 = vector.broadcast %cst_19 : f32 to vector<2x8x8xf32>
    %40 = arith.mulf %38, %39 : vector<2x8x8xf32>
    %cst_20 = arith.constant dense<0xFF800000> : vector<2x8xf32>
    %41 = vector.multi_reduction <maximumf>, %40, %cst_20 [2] : vector<2x8x8xf32> to vector<2x8xf32>
    %42 = vector.shape_cast %41 : vector<2x8xf32> to vector<2x8x1xf32>
    %43 = vector.broadcast %42 : vector<2x8x1xf32> to vector<2x8x8xf32>
    %44 = arith.subf %40, %43 : vector<2x8x8xf32>
    %45 = math.exp %44 : vector<2x8x8xf32>
    %cst_21 = arith.constant dense<0.000000e+00> : vector<2x8xf32>
    %46 = vector.multi_reduction <add>, %45, %cst_21 [2] : vector<2x8x8xf32> to vector<2x8xf32>
    %47 = vector.shape_cast %46 : vector<2x8xf32> to vector<2x8x1xf32>
    %48 = tpu.reciprocal %47 {approx = true} : vector<2x8x1xf32> -> vector<2x8x1xf32>
    %49 = vector.broadcast %48 : vector<2x8x1xf32> to vector<2x8x8xf32>
    %50 = arith.mulf %45, %49 : vector<2x8x8xf32>
    %51 = vector.extract_strided_slice %18 {offsets = [0, 0, 8], sizes = [2, 8, 8], strides = [1, 1, 1]} : vector<2x8x32xf32> to vector<2x8x8xf32>
    "tpu.trace_start"() <{level = 10 : i32, message = "bqk,bkd->bqd"}> : () -> ()
    %cst_22 = arith.constant dense<0.000000e+00> : vector<2x8x8xf32>
    %52 = tpu.matmul %50, %51, %cst_22 {dimension_numbers = #tpu.dot_dimension_numbers<[2], [1], [1], [2], [0, 0, 0, 1, 1, 2], [0], [0]>} : vector<2x8x8xf32>, vector<2x8x8xf32>, vector<2x8x8xf32> -> vector<2x8x8xf32>
    "tpu.trace_stop"() : () -> ()
    %53 = vector.extract_strided_slice %16 {offsets = [0, 0, 16], sizes = [2, 8, 8], strides = [1, 1, 1]} : vector<2x8x32xf32> to vector<2x8x8xf32>
    %54 = vector.extract_strided_slice %17 {offsets = [0, 0, 16], sizes = [2, 8, 8], strides = [1, 1, 1]} : vector<2x8x32xf32> to vector<2x8x8xf32>
    "tpu.trace_start"() <{level = 10 : i32, message = "bqd,bkd->bqk"}> : () -> ()
    %cst_23 = arith.constant dense<0.000000e+00> : vector<2x8x8xf32>
    %55 = tpu.matmul %53, %54, %cst_23 {dimension_numbers = #tpu.dot_dimension_numbers<[2], [2], [1], [1], [0, 0, 0, 1, 1, 1], [0], [0]>} : vector<2x8x8xf32>, vector<2x8x8xf32>, vector<2x8x8xf32> -> vector<2x8x8xf32>
    "tpu.trace_stop"() : () -> ()
    %cst_24 = arith.constant 0.353553385 : f32
    %56 = vector.broadcast %cst_24 : f32 to vector<2x8x8xf32>
    %57 = arith.mulf %55, %56 : vector<2x8x8xf32>
    %cst_25 = arith.constant dense<0xFF800000> : vector<2x8xf32>
    %58 = vector.multi_reduction <maximumf>, %57, %cst_25 [2] : vector<2x8x8xf32> to vector<2x8xf32>
    %59 = vector.shape_cast %58 : vector<2x8xf32> to vector<2x8x1xf32>
    %60 = vector.broadcast %59 : vector<2x8x1xf32> to vector<2x8x8xf32>
    %61 = arith.subf %57, %60 : vector<2x8x8xf32>
    %62 = math.exp %61 : vector<2x8x8xf32>
    %cst_26 = arith.constant dense<0.000000e+00> : vector<2x8xf32>
    %63 = vector.multi_reduction <add>, %62, %cst_26 [2] : vector<2x8x8xf32> to vector<2x8xf32>
    %64 = vector.shape_cast %63 : vector<2x8xf32> to vector<2x8x1xf32>
    %65 = tpu.reciprocal %64 {approx = true} : vector<2x8x1xf32> -> vector<2x8x1xf32>
    %66 = vector.broadcast %65 : vector<2x8x1xf32> to vector<2x8x8xf32>
    %67 = arith.mulf %62, %66 : vector<2x8x8xf32>
    %68 = vector.extract_strided_slice %18 {offsets = [0, 0, 16], sizes = [2, 8, 8], strides = [1, 1, 1]} : vector<2x8x32xf32> to vector<2x8x8xf32>
    "tpu.trace_start"() <{level = 10 : i32, message = "bqk,bkd->bqd"}> : () -> ()
    %cst_27 = arith.constant dense<0.000000e+00> : vector<2x8x8xf32>
    %69 = tpu.matmul %67, %68, %cst_27 {dimension_numbers = #tpu.dot_dimension_numbers<[2], [1], [1], [2], [0, 0, 0, 1, 1, 2], [0], [0]>} : vector<2x8x8xf32>, vector<2x8x8xf32>, vector<2x8x8xf32> -> vector<2x8x8xf32>
    "tpu.trace_stop"() : () -> ()
    %70 = vector.extract_strided_slice %16 {offsets = [0, 0, 24], sizes = [2, 8, 8], strides = [1, 1, 1]} : vector<2x8x32xf32> to vector<2x8x8xf32>
    %71 = vector.extract_strided_slice %17 {offsets = [0, 0, 24], sizes = [2, 8, 8], strides = [1, 1, 1]} : vector<2x8x32xf32> to vector<2x8x8xf32>
    "tpu.trace_start"() <{level = 10 : i32, message = "bqd,bkd->bqk"}> : () -> ()
    %cst_28 = arith.constant dense<0.000000e+00> : vector<2x8x8xf32>
    %72 = tpu.matmul %70, %71, %cst_28 {dimension_numbers = #tpu.dot_dimension_numbers<[2], [2], [1], [1], [0, 0, 0, 1, 1, 1], [0], [0]>} : vector<2x8x8xf32>, vector<2x8x8xf32>, vector<2x8x8xf32> -> vector<2x8x8xf32>
    "tpu.trace_stop"() : () -> ()
    %cst_29 = arith.constant 0.353553385 : f32
    %73 = vector.broadcast %cst_29 : f32 to vector<2x8x8xf32>
    %74 = arith.mulf %72, %73 : vector<2x8x8xf32>
    %cst_30 = arith.constant dense<0xFF800000> : vector<2x8xf32>
    %75 = vector.multi_reduction <maximumf>, %74, %cst_30 [2] : vector<2x8x8xf32> to vector<2x8xf32>
    %76 = vector.shape_cast %75 : vector<2x8xf32> to vector<2x8x1xf32>
    %77 = vector.broadcast %76 : vector<2x8x1xf32> to vector<2x8x8xf32>
    %78 = arith.subf %74, %77 : vector<2x8x8xf32>
    %79 = math.exp %78 : vector<2x8x8xf32>
    %cst_31 = arith.constant dense<0.000000e+00> : vector<2x8xf32>
    %80 = vector.multi_reduction <add>, %79, %cst_31 [2] : vector<2x8x8xf32> to vector<2x8xf32>
    %81 = vector.shape_cast %80 : vector<2x8xf32> to vector<2x8x1xf32>
    %82 = tpu.reciprocal %81 {approx = true} : vector<2x8x1xf32> -> vector<2x8x1xf32>
    %83 = vector.broadcast %82 : vector<2x8x1xf32> to vector<2x8x8xf32>
    %84 = arith.mulf %79, %83 : vector<2x8x8xf32>
    %85 = vector.extract_strided_slice %18 {offsets = [0, 0, 24], sizes = [2, 8, 8], strides = [1, 1, 1]} : vector<2x8x32xf32> to vector<2x8x8xf32>
    "tpu.trace_start"() <{level = 10 : i32, message = "bqk,bkd->bqd"}> : () -> ()
    %cst_32 = arith.constant dense<0.000000e+00> : vector<2x8x8xf32>
    %86 = tpu.matmul %84, %85, %cst_32 {dimension_numbers = #tpu.dot_dimension_numbers<[2], [1], [1], [2], [0, 0, 0, 1, 1, 2], [0], [0]>} : vector<2x8x8xf32>, vector<2x8x8xf32>, vector<2x8x8xf32> -> vector<2x8x8xf32>
    "tpu.trace_stop"() : () -> ()
    %87 = tpu.concatenate %35, %52, %69, %86 in 2 : vector<2x8x8xf32>, vector<2x8x8xf32>, vector<2x8x8xf32>, vector<2x8x8xf32> -> vector<2x8x32xf32>
    %88 = vector.shape_cast %87 : vector<2x8x32xf32> to vector<16x32xf32>
    %c0_33 = arith.constant 0 : index
    %c96 = arith.constant 96 : index
    %89 = vector.load %arg2[%c0_33, %c96] : memref<64x240xf32, #tpu.memory_space<vmem>>, vector<32x32xf32>
    %cst_34 = arith.constant dense<0.000000e+00> : vector<16x32xf32>
    %90 = tpu.matmul %88, %89, %cst_34 {dimension_numbers = #tpu.dot_dimension_numbers<[1], [0], [0], [1], [0, 0, 1, 1], [], []>} : vector<16x32xf32>, vector<32x32xf32>, vector<16x32xf32> -> vector<16x32xf32>
    %c0_35 = arith.constant 0 : index
    %c96_36 = arith.constant 96 : index
    %91 = vector.load %arg3[%c0_35, %c96_36] : memref<1x385xf32, #tpu.memory_space<vmem>>, vector<1x32xf32>
    %92 = vector.broadcast %91 : vector<1x32xf32> to vector<16x32xf32>
    %93 = arith.addf %90, %92 : vector<16x32xf32>
    %94 = arith.addf %0, %93 : vector<16x32xf32>
    %c0_37 = arith.constant 0 : index
    %c128 = arith.constant 128 : index
    %95 = vector.load %arg3[%c0_37, %c128] : memref<1x385xf32, #tpu.memory_space<vmem>>, vector<1x32xf32>
    %c0_38 = arith.constant 0 : index
    %c160 = arith.constant 160 : index
    %96 = vector.load %arg3[%c0_38, %c160] : memref<1x385xf32, #tpu.memory_space<vmem>>, vector<1x32xf32>
    %cst_39 = arith.constant dense<0.000000e+00> : vector<16xf32>
    %97 = vector.multi_reduction <add>, %94, %cst_39 [1] : vector<16x32xf32> to vector<16xf32>
    %98 = vector.shape_cast %97 : vector<16xf32> to vector<16x1xf32>
    %cst_40 = arith.constant 3.200000e+01 : f32
    %99 = vector.broadcast %cst_40 : f32 to vector<16x1xf32>
    %100 = arith.divf %98, %99 : vector<16x1xf32>
    %101 = vector.broadcast %100 : vector<16x1xf32> to vector<16x32xf32>
    %102 = arith.subf %94, %101 : vector<16x32xf32>
    %103 = arith.mulf %102, %102 : vector<16x32xf32>
    %cst_41 = arith.constant dense<0.000000e+00> : vector<16xf32>
    %104 = vector.multi_reduction <add>, %103, %cst_41 [1] : vector<16x32xf32> to vector<16xf32>
    %105 = vector.shape_cast %104 : vector<16xf32> to vector<16x1xf32>
    %cst_42 = arith.constant 3.200000e+01 : f32
    %106 = vector.broadcast %cst_42 : f32 to vector<16x1xf32>
    %107 = arith.divf %105, %106 : vector<16x1xf32>
    %cst_43 = arith.constant 9.99999974E-6 : f32
    %108 = vector.broadcast %cst_43 : f32 to vector<16x1xf32>
    %109 = arith.addf %107, %108 : vector<16x1xf32>
    %110 = math.rsqrt %109 : vector<16x1xf32>
    %111 = vector.broadcast %110 : vector<16x1xf32> to vector<16x32xf32>
    %112 = arith.mulf %102, %111 : vector<16x32xf32>
    %113 = vector.broadcast %95 : vector<1x32xf32> to vector<16x32xf32>
    %114 = arith.mulf %112, %113 : vector<16x32xf32>
    %115 = vector.broadcast %96 : vector<1x32xf32> to vector<16x32xf32>
    %116 = arith.addf %114, %115 : vector<16x32xf32>
    %c0_44 = arith.constant 0 : index
    %c128_45 = arith.constant 128 : index
    %117 = vector.load %arg2[%c0_44, %c128_45] : memref<64x240xf32, #tpu.memory_space<vmem>>, vector<32x64xf32>
    %cst_46 = arith.constant dense<0.000000e+00> : vector<16x64xf32>
    %118 = tpu.matmul %116, %117, %cst_46 {dimension_numbers = #tpu.dot_dimension_numbers<[1], [0], [0], [1], [0, 0, 1, 1], [], []>} : vector<16x32xf32>, vector<32x64xf32>, vector<16x64xf32> -> vector<16x64xf32>
    %c0_47 = arith.constant 0 : index
    %c192 = arith.constant 192 : index
    %119 = vector.load %arg3[%c0_47, %c192] : memref<1x385xf32, #tpu.memory_space<vmem>>, vector<1x64xf32>
    %120 = vector.broadcast %119 : vector<1x64xf32> to vector<16x64xf32>
    %121 = arith.addf %118, %120 : vector<16x64xf32>
    %cst_48 = arith.constant 0.000000e+00 : f32
    %122 = vector.broadcast %cst_48 : f32 to vector<16x64xf32>
    %123 = arith.maximumf %121, %122 : vector<16x64xf32>
    %c0_49 = arith.constant 0 : index
    %c192_50 = arith.constant 192 : index
    %124 = vector.load %arg2[%c0_49, %c192_50] : memref<64x240xf32, #tpu.memory_space<vmem>>, vector<64x32xf32>
    %cst_51 = arith.constant dense<0.000000e+00> : vector<16x32xf32>
    %125 = tpu.matmul %123, %124, %cst_51 {dimension_numbers = #tpu.dot_dimension_numbers<[1], [0], [0], [1], [0, 0, 1, 1], [], []>} : vector<16x64xf32>, vector<64x32xf32>, vector<16x32xf32> -> vector<16x32xf32>
    %c0_52 = arith.constant 0 : index
    %c256 = arith.constant 256 : index
    %126 = vector.load %arg3[%c0_52, %c256] : memref<1x385xf32, #tpu.memory_space<vmem>>, vector<1x32xf32>
    %127 = vector.broadcast %126 : vector<1x32xf32> to vector<16x32xf32>
    %128 = arith.addf %125, %127 : vector<16x32xf32>
    %129 = arith.addf %116, %128 : vector<16x32xf32>
    %c0_53 = arith.constant 0 : index
    %c288 = arith.constant 288 : index
    %130 = vector.load %arg3[%c0_53, %c288] : memref<1x385xf32, #tpu.memory_space<vmem>>, vector<1x32xf32>
    %c0_54 = arith.constant 0 : index
    %c320 = arith.constant 320 : index
    %131 = vector.load %arg3[%c0_54, %c320] : memref<1x385xf32, #tpu.memory_space<vmem>>, vector<1x32xf32>
    %cst_55 = arith.constant dense<0.000000e+00> : vector<16xf32>
    %132 = vector.multi_reduction <add>, %129, %cst_55 [1] : vector<16x32xf32> to vector<16xf32>
    %133 = vector.shape_cast %132 : vector<16xf32> to vector<16x1xf32>
    %cst_56 = arith.constant 3.200000e+01 : f32
    %134 = vector.broadcast %cst_56 : f32 to vector<16x1xf32>
    %135 = arith.divf %133, %134 : vector<16x1xf32>
    %136 = vector.broadcast %135 : vector<16x1xf32> to vector<16x32xf32>
    %137 = arith.subf %129, %136 : vector<16x32xf32>
    %138 = arith.mulf %137, %137 : vector<16x32xf32>
    %cst_57 = arith.constant dense<0.000000e+00> : vector<16xf32>
    %139 = vector.multi_reduction <add>, %138, %cst_57 [1] : vector<16x32xf32> to vector<16xf32>
    %140 = vector.shape_cast %139 : vector<16xf32> to vector<16x1xf32>
    %cst_58 = arith.constant 3.200000e+01 : f32
    %141 = vector.broadcast %cst_58 : f32 to vector<16x1xf32>
    %142 = arith.divf %140, %141 : vector<16x1xf32>
    %cst_59 = arith.constant 9.99999974E-6 : f32
    %143 = vector.broadcast %cst_59 : f32 to vector<16x1xf32>
    %144 = arith.addf %142, %143 : vector<16x1xf32>
    %145 = math.rsqrt %144 : vector<16x1xf32>
    %146 = vector.broadcast %145 : vector<16x1xf32> to vector<16x32xf32>
    %147 = arith.mulf %137, %146 : vector<16x32xf32>
    %148 = vector.broadcast %130 : vector<1x32xf32> to vector<16x32xf32>
    %149 = arith.mulf %147, %148 : vector<16x32xf32>
    %150 = vector.broadcast %131 : vector<1x32xf32> to vector<16x32xf32>
    %151 = arith.addf %149, %150 : vector<16x32xf32>
    %152 = vector.shape_cast %151 : vector<16x32xf32> to vector<2x8x32xf32>
    %cst_60 = arith.constant dense<0.000000e+00> : vector<2x32xf32>
    %153 = vector.multi_reduction <add>, %152, %cst_60 [1] : vector<2x8x32xf32> to vector<2x32xf32>
    %cst_61 = arith.constant 8.000000e+00 : f32
    %154 = vector.broadcast %cst_61 : f32 to vector<2x32xf32>
    %155 = arith.divf %153, %154 : vector<2x32xf32>
    %c0_62 = arith.constant 0 : index
    %c224 = arith.constant 224 : index
    %156 = vector.load %arg2[%c0_62, %c224] : memref<64x240xf32, #tpu.memory_space<vmem>>, vector<32x16xf32>
    %cst_63 = arith.constant dense<0.000000e+00> : vector<2x16xf32>
    %157 = tpu.matmul %155, %156, %cst_63 {dimension_numbers = #tpu.dot_dimension_numbers<[1], [0], [0], [1], [0, 0, 1, 1], [], []>} : vector<2x32xf32>, vector<32x16xf32>, vector<2x16xf32> -> vector<2x16xf32>
    %c0_64 = arith.constant 0 : index
    %c352 = arith.constant 352 : index
    %158 = vector.load %arg3[%c0_64, %c352] : memref<1x385xf32, #tpu.memory_space<vmem>>, vector<1x16xf32>
    %159 = vector.broadcast %158 : vector<1x16xf32> to vector<2x16xf32>
    %160 = arith.addf %157, %159 : vector<2x16xf32>
    %cst_65 = arith.constant 0.000000e+00 : f32
    %161 = vector.broadcast %cst_65 : f32 to vector<2x16xf32>
    %162 = arith.maximumf %160, %161 : vector<2x16xf32>
    %c0_66 = arith.constant 0 : index
    %c368 = arith.constant 368 : index
    %163 = vector.load %arg3[%c0_66, %c368] : memref<1x385xf32, #tpu.memory_space<vmem>>, vector<1x16xf32>
    %cst_67 = arith.constant dense<0.000000e+00> : vector<1x2xf32>
    %164 = tpu.matmul %163, %162, %cst_67 {dimension_numbers = #tpu.dot_dimension_numbers<[1], [1], [0], [0], [0, 0, 1, 0], [], []>} : vector<1x16xf32>, vector<2x16xf32>, vector<1x2xf32> -> vector<1x2xf32>
    %c0_68 = arith.constant 0 : index
    %c384 = arith.constant 384 : index
    %165 = vector.load %arg3[%c0_68, %c384] : memref<1x385xf32, #tpu.memory_space<vmem>>, vector<1x1xf32>
    %166 = vector.broadcast %165 : vector<1x1xf32> to vector<1x2xf32>
    %167 = arith.addf %164, %166 : vector<1x2xf32>
    %c0_69 = arith.constant 0 : index
    %c0_70 = arith.constant 0 : index
    %168 = vector.load %arg4[%c0_69, %c0_70] : memref<1x2xf32, #tpu.memory_space<vmem>>, vector<1x2xf32>
    tpu.vector_store %arg4[%c0_69, %c0_70], %167 {strides = array<i32>} : memref<1x2xf32, #tpu.memory_space<vmem>>, vector<1x2xf32>,
    return
  }
  func.func @transform_0(%arg0: i32) -> (i32, i32) {
    %c0_i32 = arith.constant 0 : i32
    %c0_i32_0 = arith.constant 0 : i32
    %c0_i32_1 = arith.constant 0 : i32
    return %c0_i32, %c0_i32_0 : i32, i32
  }
  func.func @transform_1(%arg0: i32) -> (i32, i32) {
    %c0_i32 = arith.constant 0 : i32
    %c0_i32_0 = arith.constant 0 : i32
    %c0_i32_1 = arith.constant 0 : i32
    return %c0_i32, %c0_i32_0 : i32, i32
  }
  func.func @transform_2(%arg0: i32) -> (i32, i32) {
    %c0_i32 = arith.constant 0 : i32
    %c0_i32_0 = arith.constant 0 : i32
    %c0_i32_1 = arith.constant 0 : i32
    return %c0_i32, %c0_i32_0 : i32, i32
  }
  func.func @transform_3(%arg0: i32) -> (i32, i32) {
    %c0_i32 = arith.constant 0 : i32
    %c0_i32_0 = arith.constant 0 : i32
    %c0_i32_1 = arith.constant 0 : i32
    return %c0_i32, %c0_i32_0 : i32, i32
  }
}

</mosaic_0001>

<bundles_post_ra>
// kernel: tpu_custom_call.1
= control target key start
LH: loop header
LB: loop body
LE: loop exit
PB: predicated region body
PF: predicated region fallthrough
CT: control target
= control target key end

     0   :  { %8 = vsyncpa [#allocation3], 0  ;;  %s3185_s0 = inlined_call_operand.hbm [shape: f32[16,32], index: 0, kind: input, shape index: {}]   ;;  %s3186_s1 = inlined_call_operand.hbm [shape: f32[64,240], index: 1, kind: input, shape index: {}]   ;;  %s3187_s2 = inlined_call_operand.vmem [shape: f32[1,385], index: 2, kind: input, shape index: {}]   ;;  %s3188_s3 = inlined_call_operand.hbm [shape: f32[1,2], index: 3, kind: output, shape index: {}]  }
   0x1   :  { %9 = vsyncpa [#allocation6], 0 }
   0x2   :  { %10 = vsyncpa [#allocation4], 0  ;;  %s2849_s12 = smov [#allocation2]   ;;  %s2777_s16 = scalar_lea.hbm %s3185_s0, 256 }
   0x3   :  { %s16_s13 = sshll.u32 %s2849_s12, 4  ;;  %p2778_p0 = scmp.ne.s32.totalorder %s3185_s0, %s2777_s16  ;;  %s17_s13 = int_to_ptr.vmem [resolvable:$true] %s16_s13 }
   0x4   :  { %p2781_p1 = scmp.lt.u32.totalorder %s2777_s16, %s3185_s0 }
   0x6   :  { %p2783_p2 = pnand %p2781_p1, %p2778_p0 }
   0x8   :  { %2786 = shalt.err (!%p2783_p2)
}
   0x9   :  { %s2787_s21 = scalar_lea.vmem %s17_s13, 256  ;;  %p2792_p4 = scmp.lt.s32.totalorder %s17_s13, %s17_s13 }
   0xa   :  { %p2788_p3 = scmp.ne.s32.totalorder %s17_s13, %s2787_s21  ;;  %p2793_p5 = scmp.lt.s32.totalorder %s2787_s21, %s2787_s21 }
   0xc   :  { %p2794_p6 = por %p2793_p5, %p2792_p4 }
   0xe   :  { %p2795_p7 = pnand %p2794_p6, %p2788_p3 }
  0x10   :  { %2798 = shalt.err (!%p2795_p7)
}
  0x11   :  { %s2850_s22 = smov 128   ;;  %s2851_s23 = smov 8  }
  0x12   :  { %22 = dma.hbm_to_vmem [thread:$0]  %s3185_s0, 256, %s17_s13, [#allocation3], %s2850_s22, %s2850_s22, %s2851_s23  }
  0x13   :  { %s2852_s26 = smov [#allocation5]   ;;  %s2799_s30 = scalar_lea.hbm %s3186_s1, 2048 }
  0x14   :  { %s28_s27 = sshll.u32 %s2852_s26, 4  ;;  %p2800_p8 = scmp.ne.s32.totalorder %s3186_s1, %s2799_s30  ;;  %s29_s27 = int_to_ptr.vmem [resolvable:$true] %s28_s27 }
  0x15   :  { %p2803_p9 = scmp.lt.u32.totalorder %s2799_s30, %s3186_s1 }
  0x17   :  { %p2805_p10 = pnand %p2803_p9, %p2800_p8 }
  0x19   :  { %2808 = shalt.err (!%p2805_p10)
}
  0x1a   :  { %s2809_s8 = scalar_lea.vmem %s29_s27, 2048  ;;  %p2814_p12 = scmp.lt.s32.totalorder %s29_s27, %s29_s27 }
  0x1b   :  { %p2810_p11 = scmp.ne.s32.totalorder %s29_s27, %s2809_s8  ;;  %p2815_p13 = scmp.lt.s32.totalorder %s2809_s8, %s2809_s8 }
  0x1d   :  { %p2816_p0 = por %p2815_p13, %p2814_p12 }
  0x1f   :  { %p2817_p1 = pnand %p2816_p0, %p2810_p11 }
  0x21   :  { %2820 = shalt.err (!%p2817_p1)
}
  0x22   :  { %s2853_s0 = smov 256   ;;  %s2854_s9 = smov 16  }
  0x23   :  { %34 = dma.hbm_to_vmem [thread:$0]  %s3186_s1, 2048, %s29_s27, [#allocation6], %s2853_s0, %s2853_s0, %s2854_s9  }
  0x24   :  { %2843 = dma.done.wait [#allocation3], 256  }
  0x25   :  { %2844 = vsyncadd [#allocation3], 4294967040 }
  0x26   :  { %2845 = dma.done.wait [#allocation6], 2048  }
  0x27   :  { %2846 = vsyncadd [#allocation6], 4294965248  ;;  %vm56_vm0 = vcmask 261120   ;;  %v45_v0 = vld [vmem:[#allocation5] sm:$0xff]  ;;  %v46_v1 = vld [vmem:[#allocation5 + $0x10] sm:$0xff]  ;;  %s2855_s13 = smov 96  }
  0x28   :  { %v47_v2 = vld [vmem:[#allocation5 + $0x20] sm:$0xff]  ;;  %v2913_v3 = vpack.i.bf16 %v46_v1, %v45_v0  ;;  %v48_v4 = vld [vmem:[#allocation5 + $0x30] sm:$0xff]  ;;  %v2595_v5 = vpack.c.bf16 %v46_v1, %v45_v0  ;;  %v2934_v10 = vld [vmem:[#allocation2 + $0x8] sm:$0xff]  ;;  %v2856_v19 = vmov 0.0   ;;  %vm2857_vm1 = vmmov 0   ;;  %s2858_s14 = smov 64  }
  0x29   :  { %v2915_v6 = vld [vmem:[#allocation2] sm:$0xff]  ;;  %v2599_v7 = vpack.c.bf16 %v48_v4, %v47_v2  ;;  %v2928_v9 = vpack.i.bf16 %v48_v4, %v47_v2  ;;  %vm322_vm2 = vcmask 64512   ;;  %s2859_s15 = smov 120   ;;  %s2860_s16 = smov 112   ;;  %vm1672_vm3 = vcmask 195584  }
  0x2a   :  { %2444 = vmatprep.mubr.msk.f32.mxu1 %vm56_vm0, %v2915_v6  ;;  %2433 = vmatprep.mubr.msk.f32.mxu0 %vm56_vm0, %v2915_v6  ;;  %v2924_v8 = vld [vmem:[%s3187_s2] ss:$0 sm:$0xff]  ;;  %s2861_s17 = smov 104   ;;  %s2862_s18 = smov 32   ;;  %vm1669_vm4 = vcmask 130048   ;;  %vm1965_vm5 = vcmask 523264  }
  0x2b   :  { %2676 = vrot.lane.b32.xlu0 %v2913_v3, %s2855_s13  ;;  %2596 = vmatprep.subr.bf16.mxu0 %v2595_v5  ;;  %s2863_s19 = smov 24   ;;  %vm2104_vm6 = vcmask 1041409   ;;  %vm2285_vm7 = vcmask 8192  }
  0x2c   :  { %2598 = vmatpush3.bf16.msra.mxu0 %v2595_v5  ;;  %154 = vrot.lane.b32.xlu1 %v2924_v8, %s2855_s13 }
  0x2d   :  { %2600 = vmatprep.subr.bf16.mxu0 %v2599_v7 }
  0x2f   :  { %2681 = vrot.lane.b32.xlu0 %v2928_v9, %s2855_s13 }
  0x30   :  { %2602 = vmatpush3.bf16.msra.mxu0 %v2599_v7  ;;  %2686 = vrot.lane.b32.xlu1 %v2913_v3, %s2858_s14 }
  0x33   :  { %2434 = vmatmul.mubr.msk.f32.vlgmr.msra.gmra.mrb[0].mxu0 %vm56_vm0, %v2934_v10  ;;  %2691 = vrot.lane.b32.xlu0 %v2928_v9, %s2858_s14 }
  0x34   :  { %2455 = vmatprep.mubr.msk.f32.mxu0 %vm56_vm0, %v2915_v6 }
  0x9d   :  { %v2677_v11 = vpop.permute.xlu0 %2676 }
  0x9e   :  { %v2679_v12 = vunpack.i.h.bf16 %v2677_v11  ;;  %v2678_v13 = vunpack.i.l.bf16 %v2677_v11  ;;  %v155_v22 = vpop.permute.xlu1 %154 }
  0xa0   :  { %v2603_v14 = vpack.c.bf16 %v2679_v12, %v2678_v13 }
  0xa1   :  { %v2682_v15 = vpop.permute.xlu0 %2681 }
  0xa2   :  { %v2684_v16 = vunpack.i.h.bf16 %v2682_v15  ;;  %v2683_v17 = vunpack.i.l.bf16 %v2682_v15  ;;  %2604 = vmatprep.subr.bf16.mxu1 %v2603_v14  ;;  %v2687_v29 = vpop.permute.xlu1 %2686 }
  0xa3   :  { %2606 = vmatpush3.bf16.msra.mxu1 %v2603_v14  ;;  %v2689_v30 = vunpack.i.h.bf16 %v2687_v29  ;;  %v2688_v31 = vunpack.i.l.bf16 %v2687_v29 }
  0xa4   :  { %v2607_v18 = vpack.c.bf16 %v2684_v16, %v2683_v17 }
  0xa5   :  { %v2611_v32 = vpack.c.bf16 %v2689_v30, %v2688_v31  ;;  %v2692_v33 = vpop.permute.xlu0 %2691 }
  0xa6   :  { %2608 = vmatprep.subr.bf16.mxu1 %v2607_v18  ;;  %v2694_v34 = vunpack.i.h.bf16 %v2692_v33  ;;  %v2693_v35 = vunpack.i.l.bf16 %v2692_v33 }
  0xa7   :  { %2610 = vmatpush3.bf16.msra.mxu1 %v2607_v18  ;;  %2612 = vmatprep.subr.bf16.mxu0 %v2611_v32 }
  0xa8   :  { %2458 = vmatprep.subr.mxu1 %v2856_v19  ;;  %2614 = vmatpush3.bf16.msra.mxu0 %v2611_v32  ;;  %v2615_v36 = vpack.c.bf16 %v2694_v34, %v2693_v35 }
  0xaa   :  { %2445 = vmatmul.mubr.msk.f32.vlgmr.msra.gmra.mrb[0].mxu1 %vm56_vm0, %v2934_v10  ;;  %2616 = vmatprep.subr.bf16.mxu0 %v2615_v36 }
  0xab   :  { %2460 = vmatprep.mubr.msk.f32.mxu1 %vm2857_vm1, %v2856_v19 }
  0xac   :  { %2618 = vmatpush3.bf16.msra.mxu0 %v2615_v36 }
  0xad   :  { %2468 = vmatprep.subr.mxu0 %v2856_v19 }
  0xaf   :  { %2456 = vmatmul.mubr.msk.f32.vlgmr.msra.gmra.mrb[2].mxu0 %vm56_vm0, %v2934_v10 }
  0xb0   :  { %2470 = vmatprep.mubr.msk.f32.mxu0 %vm2857_vm1, %v2856_v19 }
 0x106   :  { %v2435_v20 = vpop.f32.mrb[0].mxu0 }
 0x107   :  { %v129_v21 = vpop.f32.mrb[1].mxu0  ;;  %v2966_v28 = vadd.f32 %v2435_v20, %v2924_v8 }
 0x108   :  { %v2952_v26 = vadd.f32 %v2924_v8, %v129_v21 }
 0x17d   :  { %v2446_v23 = vpop.f32.mrb[0].mxu1 }
 0x17e   :  { %v223_v24 = vpop.f32.mrb[1].mxu1  ;;  %v2957_v27 = vadd.f32 %v2446_v23, %v155_v22 }
 0x17f   :  { %v2949_v25 = vadd.f32 %v223_v24, %v155_v22 }
 0x181   :  { %2459 = vmatpush3.xpose.msk.msra.mxu1 %vm322_vm2, %v2949_v25 }
 0x182   :  { %2463 = vmatprep.subr.mxu1 %v2856_v19  ;;  %v2457_v45 = vpop.f32.mrb[2].mxu0 }
 0x183   :  { %v313_v46 = vpop.f32.mrb[3].mxu0 }
 0x184   :  { %2461 = vmatmul.mubr.msk.f32.vlgmr.msra.gmra.mrb[2].mxu1 %vm322_vm2, %v2952_v26 }
 0x185   :  { %2464 = vmatpush3.xpose.msk.msra.mxu1 %vm322_vm2, %v2957_v27  ;;  %2465 = vmatprep.mubr.msk.f32.mxu1 %vm2857_vm1, %v2856_v19 }
 0x186   :  { %2473 = vmatprep.subr.mxu1 %v2856_v19 }
 0x188   :  { %2466 = vmatmul.mubr.msk.f32.vlgmr.msra.gmra.mrb[4].mxu1 %vm322_vm2, %v2966_v28 }
 0x189   :  { %2475 = vmatprep.mubr.msk.f32.mxu1 %vm2857_vm1, %v2856_v19 }
 0x257   :  { %v395_v37 = vpop.f32.mrb[2].mxu1 }
 0x258   :  { %v475_v38 = vmul.f32 0.35355338, %v395_v37  ;;  %v2462_v39 = vpop.f32.mrb[3].mxu1 }
 0x25a   :  { %v477_v40 = vsel %vm322_vm2, %v475_v38, -inf }
 0x25b   :  { %478 = vmax.xlane.f32.xlu1 %v477_v40  ;;  %v471_v41 = vpop.f32.mrb[4].mxu1 }
 0x25c   :  { %v476_v42 = vmul.f32 0.35355338, %v471_v41  ;;  %v2467_v43 = vpop.f32.mrb[5].mxu1 }
 0x25e   :  { %v480_v44 = vsel %vm322_vm2, %v476_v42, -inf }
 0x25f   :  { %481 = vmax.xlane.f32.xlu0 %v480_v44 }
 0x26c   :  { %647 = vrot.lane.b32.xlu1 %v2949_v25, %s2859_s15 }
 0x270   :  { %725 = vrot.lane.b32.xlu1 %v2957_v27, %s2859_s15 }
 0x275   :  { %244 = vrot.lane.b32.xlu0 %v2924_v8, %s2858_s14 }
 0x2e8   :  { %v479_v47 = vpop.xlane.xlu1 %478 }
 0x2e9   :  { %v483_v48 = vsub.f32 %v475_v38, %v479_v47 }
 0x2eb   :  { %v485_v49 = vmul.f32 1.442695, %v483_v48 }
 0x2ec   :  { %v482_v50 = vpop.xlane.xlu0 %481  ;;  %v648_v60 = vpop.permute.xlu1 %647 }
 0x2ed   :  { %2737 = vpow2.f32 %v485_v49  ;;  %v484_v51 = vsub.f32 %v476_v42, %v482_v50 }
 0x2ef   :  { %v487_v52 = vmul.f32 1.442695, %v484_v51 }
 0x2f0   :  { %v245_v53 = vpop.permute.xlu0 %244  ;;  %v726_v61 = vpop.permute.xlu1 %725 }
 0x2f1   :  { %2739 = vpow2.f32 %v487_v52  ;;  %v2986_v54 = vadd.f32 %v313_v46, %v245_v53  ;;  %v2988_v55 = vadd.f32 %v2457_v45, %v245_v53 }
 0x2f3   :  { %2469 = vmatpush3.msra.mxu0 %v2986_v54  ;;  %2474 = vmatpush3.msra.mxu1 %v2988_v55 }
 0x2f4   :  { %2478 = vmatprep.subr.mxu0 %v2856_v19  ;;  %2483 = vmatprep.subr.mxu1 %v2856_v19 }
 0x2f7   :  { %v2738_v56 = vpop.eup %2737 }
 0x2f8   :  { %v489_v57 = vsel %vm322_vm2, %v2738_v56, 0.0 }
 0x2f9   :  { %490 = vadd.xlane.f32.xlu0 %v489_v57 }
 0x2fb   :  { %v2740_v58 = vpop.eup %2739 }
 0x2fc   :  { %v492_v59 = vsel %vm322_vm2, %v2740_v58, 0.0 }
 0x2fd   :  { %493 = vadd.xlane.f32.xlu1 %v492_v59 }
 0x30e   :  { %723 = vrot.lane.b32.xlu1 %v2966_v28, %s2859_s15 }
 0x30f   :  { %645 = vrot.lane.b32.xlu0 %v2952_v26, %s2859_s15 }
 0x386   :  { %v491_v62 = vpop.xlane.xlu0 %490 }
 0x387   :  { %2741 = vrcp.f32 %v491_v62 }
 0x38a   :  { %v494_v63 = vpop.xlane.xlu1 %493  ;;  %v646_v5 = vpop.permute.xlu0 %645 }
 0x38b   :  { %2743 = vrcp.f32 %v494_v63 }
 0x38e   :  { %v724_v7 = vpop.permute.xlu1 %723 }
 0x391   :  { %v2742_v0 = vpop.eup %2741 }
 0x392   :  { %v497_v1 = vmul.f32 %v2742_v0, %v2738_v56 }
 0x394   :  { %2471 = vmatmul.mubr.msk.f32.vlgmr.msra.gmra.mrb[4].mxu0 %vm322_vm2, %v497_v1 }
 0x395   :  { %v2744_v2 = vpop.eup %2743  ;;  %2479 = vmatpush3.xpose.msk.msra.mxu0 %vm322_vm2, %v648_v60  ;;  %2480 = vmatprep.mubr.msk.f32.mxu0 %vm2857_vm1, %v2856_v19 }
 0x396   :  { %v498_v4 = vmul.f32 %v2744_v2, %v2740_v58  ;;  %2488 = vmatprep.subr.mxu0 %v2856_v19 }
 0x398   :  { %2476 = vmatmul.mubr.msk.f32.vlgmr.msra.gmra.mrb[6].mxu1 %vm322_vm2, %v498_v4  ;;  %2481 = vmatmul.mubr.msk.f32.vlgmr.msra.gmra.mrb[6].mxu0 %vm322_vm2, %v646_v5 }
 0x399   :  { %2484 = vmatpush3.xpose.msk.msra.mxu1 %vm322_vm2, %v726_v61  ;;  %2485 = vmatprep.mubr.msk.f32.mxu1 %vm2857_vm1, %v2856_v19 }
 0x39a   :  { %2493 = vmatprep.subr.mxu1 %v2856_v19  ;;  %2490 = vmatprep.mubr.msk.f32.mxu0 %vm2857_vm1, %v2856_v19 }
 0x39c   :  { %2486 = vmatmul.mubr.msk.f32.vlgmr.msra.gmra.mrb[8].mxu1 %vm322_vm2, %v724_v7 }
 0x39d   :  { %2495 = vmatprep.mubr.msk.f32.mxu1 %vm2857_vm1, %v2856_v19 }
 0x467   :  { %v3016_v11 = vpop.f32.mrb[4].mxu0 }
 0x468   :  { %v2472_v12 = vpop.f32.mrb[5].mxu0 }
 0x46b   :  { %v3018_v13 = vpop.f32.mrb[6].mxu1  ;;  %v719_v14 = vpop.f32.mrb[6].mxu0 }
 0x46c   :  { %v801_v15 = vmul.f32 0.35355338, %v719_v14  ;;  %v2477_v16 = vpop.f32.mrb[7].mxu1  ;;  %v2482_v17 = vpop.f32.mrb[7].mxu0 }
 0x46e   :  { %v803_v18 = vsel %vm322_vm2, %v801_v15, -inf }
 0x46f   :  { %804 = vmax.xlane.f32.xlu0 %v803_v18  ;;  %v797_v20 = vpop.f32.mrb[8].mxu1 }
 0x470   :  { %v802_v21 = vmul.f32 0.35355338, %v797_v20  ;;  %v2487_v22 = vpop.f32.mrb[9].mxu1 }
 0x472   :  { %v806_v23 = vsel %vm322_vm2, %v802_v21, -inf }
 0x473   :  { %807 = vmax.xlane.f32.xlu1 %v806_v23 }
 0x484   :  { %826 = vrot.lane.b32.xlu1 %v2986_v54, %s2859_s15 }
 0x485   :  { %903 = vrot.lane.b32.xlu0 %v2988_v55, %s2859_s15 }
 0x488   :  { %981 = vrot.lane.b32.xlu1 %v2949_v25, %s2860_s16 }
 0x48c   :  { %1059 = vrot.lane.b32.xlu1 %v2957_v27, %s2860_s16 }
 0x490   :  { %1057 = vrot.lane.b32.xlu1 %v2966_v28, %s2860_s16 }
 0x4fc   :  { %v805_v24 = vpop.xlane.xlu0 %804 }
 0x4fd   :  { %v809_v29 = vsub.f32 %v801_v15, %v805_v24 }
 0x4ff   :  { %v811_v30 = vmul.f32 1.442695, %v809_v29 }
 0x500   :  { %v904_v31 = vpop.permute.xlu0 %903  ;;  %v808_v32 = vpop.xlane.xlu1 %807 }
 0x501   :  { %2745 = vpow2.f32 %v811_v30  ;;  %v810_v33 = vsub.f32 %v802_v21, %v808_v32  ;;  %2494 = vmatpush3.msra.mxu1 %v904_v31 }
 0x502   :  { %2503 = vmatprep.subr.mxu1 %v2856_v19 }
 0x503   :  { %v813_v34 = vmul.f32 1.442695, %v810_v33 }
 0x504   :  { %v827_v35 = vpop.permute.xlu1 %826 }
 0x505   :  { %2747 = vpow2.f32 %v813_v34  ;;  %2489 = vmatpush3.msra.mxu0 %v827_v35 }
 0x506   :  { %2498 = vmatprep.subr.mxu0 %v2856_v19 }
 0x508   :  { %v982_v42 = vpop.permute.xlu1 %981 }
 0x50b   :  { %v2746_v36 = vpop.eup %2745 }
 0x50c   :  { %v815_v37 = vsel %vm322_vm2, %v2746_v36, 0.0  ;;  %v1060_v46 = vpop.permute.xlu1 %1059 }
 0x50d   :  { %816 = vadd.xlane.f32.xlu0 %v815_v37 }
 0x50f   :  { %v2748_v38 = vpop.eup %2747 }
 0x510   :  { %v818_v39 = vsel %vm322_vm2, %v2748_v38, 0.0  ;;  %v1058_v49 = vpop.permute.xlu1 %1057 }
 0x511   :  { %819 = vadd.xlane.f32.xlu0 %v818_v39 }
 0x527   :  { %979 = vrot.lane.b32.xlu0 %v2952_v26, %s2860_s16 }
 0x59a   :  { %v817_v40 = vpop.xlane.xlu0 %816 }
 0x59b   :  { %2749 = vrcp.f32 %v817_v40 }
 0x59e   :  { %v820_v41 = vpop.xlane.xlu0 %819 }
 0x59f   :  { %2751 = vrcp.f32 %v820_v41 }
 0x5a2   :  { %v980_v48 = vpop.permute.xlu0 %979 }
 0x5a5   :  { %v2750_v43 = vpop.eup %2749 }
 0x5a6   :  { %v823_v44 = vmul.f32 %v2750_v43, %v2746_v36 }
 0x5a8   :  { %2491 = vmatmul.mubr.msk.f32.vlgmr.msra.gmra.mrb[8].mxu0 %vm322_vm2, %v823_v44 }
 0x5a9   :  { %v2752_v45 = vpop.eup %2751  ;;  %2499 = vmatpush3.xpose.msk.msra.mxu0 %vm322_vm2, %v982_v42  ;;  %2500 = vmatprep.mubr.msk.f32.mxu0 %vm2857_vm1, %v2856_v19 }
 0x5aa   :  { %v824_v47 = vmul.f32 %v2752_v45, %v2748_v38  ;;  %2508 = vmatprep.subr.mxu0 %v2856_v19 }
 0x5ac   :  { %2496 = vmatmul.mubr.msk.f32.vlgmr.msra.gmra.mrb[10].mxu1 %vm322_vm2, %v824_v47  ;;  %2501 = vmatmul.mubr.msk.f32.vlgmr.msra.gmra.mrb[10].mxu0 %vm322_vm2, %v980_v48 }
 0x5ad   :  { %2504 = vmatpush3.xpose.msk.msra.mxu1 %vm322_vm2, %v1060_v46  ;;  %2505 = vmatprep.mubr.msk.f32.mxu1 %vm2857_vm1, %v2856_v19 }
 0x5ae   :  { %2513 = vmatprep.subr.mxu1 %v2856_v19  ;;  %2510 = vmatprep.mubr.msk.f32.mxu0 %vm2857_vm1, %v2856_v19 }
 0x5b0   :  { %2506 = vmatmul.mubr.msk.f32.vlgmr.msra.gmra.mrb[12].mxu1 %vm322_vm2, %v1058_v49 }
 0x5b1   :  { %2515 = vmatprep.mubr.msk.f32.mxu1 %vm2857_vm1, %v2856_v19 }
 0x67b   :  { %v3054_v50 = vpop.f32.mrb[8].mxu0 }
 0x67c   :  { %v2492_v51 = vpop.f32.mrb[9].mxu0 }
 0x67f   :  { %v3056_v52 = vpop.f32.mrb[10].mxu1  ;;  %v1053_v53 = vpop.f32.mrb[10].mxu0 }
 0x680   :  { %v1135_v56 = vmul.f32 0.35355338, %v1053_v53  ;;  %v2497_v57 = vpop.f32.mrb[11].mxu1  ;;  %v2502_v58 = vpop.f32.mrb[11].mxu0 }
 0x682   :  { %v1137_v59 = vsel %vm322_vm2, %v1135_v56, -inf }
 0x683   :  { %1138 = vmax.xlane.f32.xlu0 %v1137_v59  ;;  %v1131_v60 = vpop.f32.mrb[12].mxu1 }
 0x684   :  { %v1136_v61 = vmul.f32 0.35355338, %v1131_v60  ;;  %v2507_v62 = vpop.f32.mrb[13].mxu1 }
 0x686   :  { %v1140_v63 = vsel %vm322_vm2, %v1136_v61, -inf }
 0x687   :  { %1141 = vmax.xlane.f32.xlu1 %v1140_v63 }
 0x698   :  { %1159 = vrot.lane.b32.xlu1 %v2986_v54, %s2860_s16 }
 0x699   :  { %1235 = vrot.lane.b32.xlu0 %v2988_v55, %s2860_s16 }
 0x69c   :  { %1313 = vrot.lane.b32.xlu1 %v2949_v25, %s2861_s17 }
 0x6a0   :  { %1391 = vrot.lane.b32.xlu1 %v2957_v27, %s2861_s17 }
 0x6a4   :  { %1389 = vrot.lane.b32.xlu1 %v2966_v28, %s2861_s17 }
 0x710   :  { %v1139_v0 = vpop.xlane.xlu0 %1138 }
 0x711   :  { %v1143_v1 = vsub.f32 %v1135_v56, %v1139_v0 }
 0x713   :  { %v1145_v2 = vmul.f32 1.442695, %v1143_v1 }
 0x714   :  { %v1236_v4 = vpop.permute.xlu0 %1235  ;;  %v1142_v5 = vpop.xlane.xlu1 %1141 }
 0x715   :  { %2753 = vpow2.f32 %v1145_v2  ;;  %v1144_v7 = vsub.f32 %v1136_v61, %v1142_v5  ;;  %2514 = vmatpush3.msra.mxu1 %v1236_v4 }
 0x716   :  { %2523 = vmatprep.subr.mxu1 %v2856_v19 }
 0x717   :  { %v1147_v12 = vmul.f32 1.442695, %v1144_v7 }
 0x718   :  { %v1160_v14 = vpop.permute.xlu1 %1159 }
 0x719   :  { %2755 = vpow2.f32 %v1147_v12  ;;  %2509 = vmatpush3.msra.mxu0 %v1160_v14 }
 0x71a   :  { %2518 = vmatprep.subr.mxu0 %v2856_v19 }
 0x71c   :  { %v1314_v18 = vpop.permute.xlu1 %1313 }
 0x71f   :  { %v2754_v25 = vpop.eup %2753 }
 0x720   :  { %v1149_v27 = vsel %vm322_vm2, %v2754_v25, 0.0  ;;  %v1392_v23 = vpop.permute.xlu1 %1391 }
 0x721   :  { %1150 = vadd.xlane.f32.xlu0 %v1149_v27 }
 0x723   :  { %v2756_v28 = vpop.eup %2755 }
 0x724   :  { %v1152_v15 = vsel %vm322_vm2, %v2756_v28, 0.0  ;;  %v1390_v29 = vpop.permute.xlu1 %1389 }
 0x725   :  { %1153 = vadd.xlane.f32.xlu0 %v1152_v15 }
 0x73b   :  { %1311 = vrot.lane.b32.xlu0 %v2952_v26, %s2861_s17 }
 0x7ae   :  { %v1151_v16 = vpop.xlane.xlu0 %1150 }
 0x7af   :  { %2757 = vrcp.f32 %v1151_v16 }
 0x7b2   :  { %v1154_v17 = vpop.xlane.xlu0 %1153 }
 0x7b3   :  { %2759 = vrcp.f32 %v1154_v17 }
 0x7b6   :  { %v1312_v26 = vpop.permute.xlu0 %1311 }
 0x7b9   :  { %v2758_v20 = vpop.eup %2757 }
 0x7ba   :  { %v1157_v21 = vmul.f32 %v2758_v20, %v2754_v25 }
 0x7bc   :  { %2511 = vmatmul.mubr.msk.f32.vlgmr.msra.gmra.mrb[12].mxu0 %vm322_vm2, %v1157_v21 }
 0x7bd   :  { %v2760_v22 = vpop.eup %2759  ;;  %2519 = vmatpush3.xpose.msk.msra.mxu0 %vm322_vm2, %v1314_v18  ;;  %2520 = vmatprep.mubr.msk.f32.mxu0 %vm2857_vm1, %v2856_v19 }
 0x7be   :  { %v1158_v24 = vmul.f32 %v2760_v22, %v2756_v28  ;;  %2528 = vmatprep.subr.mxu0 %v2856_v19 }
 0x7c0   :  { %2516 = vmatmul.mubr.msk.f32.vlgmr.msra.gmra.mrb[14].mxu1 %vm322_vm2, %v1158_v24  ;;  %2521 = vmatmul.mubr.msk.f32.vlgmr.msra.gmra.mrb[14].mxu0 %vm322_vm2, %v1312_v26 }
 0x7c1   :  { %2524 = vmatpush3.xpose.msk.msra.mxu1 %vm322_vm2, %v1392_v23  ;;  %2525 = vmatprep.mubr.msk.f32.mxu1 %vm2857_vm1, %v2856_v19 }
 0x7c2   :  { %2533 = vmatprep.subr.mxu1 %v2856_v19  ;;  %2530 = vmatprep.mubr.msk.f32.mxu0 %vm2857_vm1, %v2856_v19 }
 0x7c4   :  { %2526 = vmatmul.mubr.msk.f32.vlgmr.msra.gmra.mrb[16].mxu1 %vm322_vm2, %v1390_v29 }
 0x7c5   :  { %2535 = vmatprep.mubr.msk.f32.mxu1 %vm2857_vm1, %v2856_v19 }
 0x88f   :  { %v1231_v30 = vpop.f32.mrb[12].mxu0 }
 0x890   :  { %v2512_v31 = vpop.f32.mrb[13].mxu0 }
 0x893   :  { %v1307_v32 = vpop.f32.mrb[14].mxu1  ;;  %v1385_v33 = vpop.f32.mrb[14].mxu0 }
 0x894   :  { %v1467_v34 = vmul.f32 0.35355338, %v1385_v33  ;;  %v2517_v35 = vpop.f32.mrb[15].mxu1  ;;  %v2522_v36 = vpop.f32.mrb[15].mxu0 }
 0x896   :  { %v1469_v37 = vsel %vm322_vm2, %v1467_v34, -inf }
 0x897   :  { %1470 = vmax.xlane.f32.xlu0 %v1469_v37  ;;  %v1463_v38 = vpop.f32.mrb[16].mxu1 }
 0x898   :  { %v1468_v39 = vmul.f32 0.35355338, %v1463_v38  ;;  %v2527_v40 = vpop.f32.mrb[17].mxu1 }
 0x89a   :  { %v1472_v41 = vsel %vm322_vm2, %v1468_v39, -inf }
 0x89b   :  { %1473 = vmax.xlane.f32.xlu1 %v1472_v41  ;;  %v1829_v41 = vld [vmem:[#allocation5 + $0x18] sm:$0xff] }
 0x8ac   :  { %1491 = vrot.lane.b32.xlu1 %v2986_v54, %s2861_s17 }
 0x8b0   :  { %2696 = vrot.lane.b32.xlu1 %v2913_v3, %s2862_s18 }
 0x8b4   :  { %2701 = vrot.lane.b32.xlu1 %v2928_v9, %s2862_s18 }
 0x8b8   :  { %1647 = vrot.lane.b32.xlu1 %v3056_v52, %s2851_s23 }
 0x8bc   :  { %1655 = vrot.lane.b32.xlu1 %v1307_v32, %s2854_s9 }
 0x924   :  { %v1471_v42 = vpop.xlane.xlu0 %1470 }
 0x925   :  { %v1475_v43 = vsub.f32 %v1467_v34, %v1471_v42  ;;  %v2337_v42 = vld [vmem:[%s3187_s2 + $0x1] ss:$0 sm:$0xff] }
 0x927   :  { %v1477_v44 = vmul.f32 1.442695, %v1475_v43 }
 0x928   :  { %v1474_v45 = vpop.xlane.xlu1 %1473 }
 0x929   :  { %2761 = vpow2.f32 %v1477_v44  ;;  %v1476_v46 = vsub.f32 %v1468_v39, %v1474_v45  ;;  %v1830_v44 = vld [vmem:[#allocation5 + $0x28] sm:$0xff]  ;;  %v1831_v45 = vld [vmem:[#allocation5 + $0x38] sm:$0xff] }
 0x92b   :  { %v1479_v47 = vmul.f32 1.442695, %v1476_v46  ;;  %v2631_v46 = vpack.c.bf16 %v1831_v45, %v1830_v44 }
 0x92c   :  { %v1492_v54 = vpop.permute.xlu1 %1491 }
 0x92d   :  { %2763 = vpow2.f32 %v1479_v47  ;;  %2529 = vmatpush3.msra.mxu0 %v1492_v54  ;;  %v1922_v54 = vld [vmem:[#allocation5 + $0x48] sm:$0xff] }
 0x930   :  { %v2697_v48 = vpop.permute.xlu1 %2696 }
 0x931   :  { %v2699_v3 = vunpack.i.h.bf16 %v2697_v48  ;;  %v2698_v49 = vunpack.i.l.bf16 %v2697_v48  ;;  %v1923_v48 = vld [vmem:[#allocation5 + $0x58] sm:$0xff] }
 0x933   :  { %v2762_v51 = vpop.eup %2761  ;;  %v2619_v9 = vpack.c.bf16 %v2699_v3, %v2698_v49  ;;  %v2715_v3 = vpack.i.bf16 %v1923_v48, %v1922_v54  ;;  %v3136_v49 = vpack.i.bf16 %v1831_v45, %v1830_v44 }
 0x934   :  { %v1481_v53 = vsel %vm322_vm2, %v2762_v51, 0.0  ;;  %v2702_v59 = vpop.permute.xlu1 %2701 }
 0x935   :  { %1482 = vadd.xlane.f32.xlu0 %v1481_v53  ;;  %2620 = vmatprep.subr.bf16.mxu0 %v2619_v9  ;;  %v2704_v60 = vunpack.i.h.bf16 %v2702_v59  ;;  %v2703_v61 = vunpack.i.l.bf16 %v2702_v59 }
 0x937   :  { %v2764_v52 = vpop.eup %2763  ;;  %v2623_v0 = vpack.c.bf16 %v2704_v60, %v2703_v61 }
 0x938   :  { %v1484_v56 = vsel %vm322_vm2, %v2764_v52, 0.0  ;;  %v1648_v14 = vpop.permute.xlu1 %1647 }
 0x939   :  { %1485 = vadd.xlane.f32.xlu0 %v1484_v56  ;;  %v1668_v18 = vsel %vm322_vm2, %v3018_v13, %v1648_v14 }
 0x93c   :  { %v1656_v28 = vpop.permute.xlu1 %1655 }
 0x94f   :  { %1567 = vrot.lane.b32.xlu0 %v2988_v55, %s2861_s17 }
 0x953   :  { %1645 = vrot.lane.b32.xlu0 %v3054_v50, %s2851_s23 }
 0x957   :  { %1653 = vrot.lane.b32.xlu0 %v1231_v30, %s2854_s9 }
 0x9c2   :  { %v1483_v57 = vpop.xlane.xlu0 %1482 }
 0x9c3   :  { %2765 = vrcp.f32 %v1483_v57 }
 0x9c6   :  { %v1486_v58 = vpop.xlane.xlu0 %1485 }
 0x9c7   :  { %2767 = vrcp.f32 %v1486_v58 }
 0x9ca   :  { %v1568_v62 = vpop.permute.xlu0 %1567 }
 0x9cb   :  { %2534 = vmatpush3.msra.mxu1 %v1568_v62 }
 0x9cd   :  { %v2766_v63 = vpop.eup %2765 }
 0x9ce   :  { %v1489_v1 = vmul.f32 %v2766_v63, %v2762_v51  ;;  %v1646_v12 = vpop.permute.xlu0 %1645  ;;  %v1924_v51 = vld [vmem:[#allocation5 + $0x68] sm:$0xff] }
 0x9cf   :  { %v1667_v27 = vsel %vm322_vm2, %v3016_v11, %v1646_v12 }
 0x9d0   :  { %2531 = vmatmul.mubr.msk.f32.vlgmr.msra.gmra.mrb[16].mxu0 %vm322_vm2, %v1489_v1 }
 0x9d1   :  { %v2768_v55 = vpop.eup %2767  ;;  %2622 = vmatpush3.bf16.msra.mxu0 %v2619_v9  ;;  %v1925_v9 = vld [vmem:[#allocation5 + $0x78] sm:$0xff] }
 0x9d2   :  { %v1490_v2 = vmul.f32 %v2768_v55, %v2764_v52  ;;  %2624 = vmatprep.subr.bf16.mxu0 %v2623_v0  ;;  %v1654_v25 = vpop.permute.xlu0 %1653  ;;  %v2720_v53 = vpack.i.bf16 %v1925_v9, %v1924_v51 }
 0x9d3   :  { %v1670_v15 = vsel %vm1669_vm4, %v1667_v27, %v1654_v25 }
 0x9d4   :  { %2536 = vmatmul.mubr.msk.f32.vlgmr.msra.gmra.mrb[18].mxu1 %vm322_vm2, %v1490_v2 }
 0x9d5   :  { %2626 = vmatpush3.bf16.msra.mxu0 %v2623_v0 }
 0xaa3   :  { %v1563_v50 = vpop.f32.mrb[16].mxu0 }
 0xaa4   :  { %1661 = vrot.lane.b32.xlu0 %v1563_v50, %s2863_s19  ;;  %v2532_v4 = vpop.f32.mrb[17].mxu0 }
 0xaa7   :  { %v1639_v5 = vpop.f32.mrb[18].mxu1 }
 0xaa8   :  { %1663 = vrot.lane.b32.xlu1 %v1639_v5, %s2863_s19  ;;  %v2537_v7 = vpop.f32.mrb[19].mxu1  ;;  %1701 = vrot.lane.b32.xlu0 %v2924_v8, %s2862_s18  ;;  %v1671_v8 = vsel %vm1669_vm4, %v1668_v18, %v1656_v28 }
 0xb16   :  { %v1662_v16 = vpop.permute.xlu0 %1661 }
 0xb17   :  { %v1673_v17 = vsel %vm1672_vm3, %v1670_v15, %v1662_v16 }
 0xb18   :  { %2546 = vmatprep.mubr.msk.f32.mxu0 %vm56_vm0, %v1673_v17 }
 0xb1a   :  { %v1664_v20 = vpop.permute.xlu1 %1663  ;;  %v1702_v22 = vpop.permute.xlu0 %1701 }
 0xb1b   :  { %v1674_v21 = vsel %vm1672_vm3, %v1671_v8, %v1664_v20 }
 0xb1c   :  { %2547 = vmatmul.mubr.msk.f32.vlgmr.msra.gmra.mrb[18].mxu0 %vm56_vm0, %v1674_v21 }
 0xbef   :  { %v2548_v23 = vpop.f32.mrb[18].mxu0 }
 0xbf0   :  { %v1782_v24 = vadd.f32 %v2548_v23, %v1702_v22  ;;  %v1776_v11 = vpop.f32.mrb[19].mxu0 }
 0xbf1   :  { %v1777_v26 = vadd.f32 %v1776_v11, %v1702_v22 }
 0xbf2   :  { %v1786_v29 = vadd.f32 %v1782_v24, %v2934_v10 }
 0xbf3   :  { %v1785_v30 = vadd.f32 %v1777_v26, %v2915_v6  ;;  %v1828_v6 = vld [vmem:[#allocation5 + $0x8] sm:$0xff] }
 0xbf4   :  { %v1791_v31 = vsel %vm56_vm0, %v1786_v29, 0.0  ;;  %v2627_v43 = vpack.c.bf16 %v1829_v41, %v1828_v6  ;;  %v3132_v47 = vpack.i.bf16 %v1829_v41, %v1828_v6 }
 0xbf5   :  { %1792 = vadd.xlane.f32.xlu0 %v1791_v31  ;;  %v1788_v13 = vsel %vm56_vm0, %v1785_v30, 0.0 }
 0xbf6   :  { %1789 = vadd.xlane.f32.xlu1 %v1788_v13  ;;  %2628 = vmatprep.subr.bf16.mxu1 %v2627_v43 }
 0xbf7   :  { %2630 = vmatpush3.bf16.msra.mxu1 %v2627_v43 }
 0xbf8   :  { %2632 = vmatprep.subr.bf16.mxu1 %v2631_v46 }
 0xbfb   :  { %2634 = vmatpush3.bf16.msra.mxu1 %v2631_v46 }
 0xc82   :  { %v1793_v32 = vpop.xlane.xlu0 %1792 }
 0xc83   :  { %v1796_v33 = vmul.f32 0.03125, %v1793_v32  ;;  %v1790_v34 = vpop.xlane.xlu1 %1789  ;;  %v2340_v32 = vld [vmem:[%s3187_s2 + $0x2] ss:$0 sm:$0xff] }
 0xc84   :  { %v1795_v35 = vmul.f32 0.03125, %v1790_v34 }
 0xc85   :  { %v1798_v36 = vsub.f32 %v1786_v29, %v1796_v33 }
 0xc86   :  { %v1797_v37 = vsub.f32 %v1785_v30, %v1795_v35 }
 0xc87   :  { %v1800_v38 = vmul.f32 %v1798_v36, %v1798_v36 }
 0xc88   :  { %v1799_v39 = vmul.f32 %v1797_v37, %v1797_v37 }
 0xc89   :  { %v1804_v40 = vsel %vm56_vm0, %v1800_v38, 0.0 }
 0xc8a   :  { %1805 = vadd.xlane.f32.xlu1 %v1804_v40  ;;  %v1801_v10 = vsel %vm56_vm0, %v1799_v39, 0.0 }
 0xc8b   :  { %1802 = vadd.xlane.f32.xlu0 %v1801_v10 }
 0xc9b   :  { %2706 = vrot.lane.b32.xlu1 %v3132_v47, %s2858_s14 }
 0xc9f   :  { %2711 = vrot.lane.b32.xlu1 %v3136_v49, %s2858_s14 }
 0xca1   :  { %1823 = vrot.lane.b32.xlu0 %v2337_v42, %s2855_s13 }
 0xca3   :  { %2721 = vrot.lane.b32.xlu1 %v2720_v53, %s2858_s14 }
 0xca5   :  { %2716 = vrot.lane.b32.xlu0 %v2715_v3, %s2858_s14  ;;  %v2864_v3 = vmov 0.0|0.0  }
 0xca6   :  { %2651 = vmatprep.subr.bf16.mxu1 %v2864_v3 }
 0xca9   :  { %1832 = vrot.lane.b32.xlu0 %v2337_v42, %s2858_s14 }
 0xd17   :  { %v1806_v52 = vpop.xlane.xlu1 %1805 }
 0xd18   :  { %v1808_v56 = vmul.f32 0.03125, %v1806_v52  ;;  %v1803_v57 = vpop.xlane.xlu0 %1802 }
 0xd19   :  { %v1807_v58 = vmul.f32 0.03125, %v1803_v57 }
 0xd1a   :  { %v1810_v59 = vadd.f32 1e-05, %v1808_v56 }
 0xd1b   :  { %v1809_v60 = vadd.f32 1e-05, %v1807_v58  ;;  %v2707_v62 = vpop.permute.xlu1 %2706 }
 0xd1c   :  { %2769 = vrsqrt.f32 %v1810_v59  ;;  %v1824_v61 = vpop.permute.xlu0 %1823  ;;  %v2709_v63 = vunpack.i.h.bf16 %v2707_v62  ;;  %v2708_v0 = vunpack.i.l.bf16 %v2707_v62 }
 0xd1d   :  { %2771 = vrsqrt.f32 %v1809_v60 }
 0xd1e   :  { %v2635_v2 = vpack.c.bf16 %v2709_v63, %v2708_v0 }
 0xd1f   :  { %v2712_v12 = vpop.permute.xlu1 %2711 }
 0xd20   :  { %v2717_v1 = vpop.permute.xlu0 %2716  ;;  %v2714_v25 = vunpack.i.h.bf16 %v2712_v12  ;;  %v2713_v27 = vunpack.i.l.bf16 %v2712_v12  ;;  %2636 = vmatprep.subr.bf16.mxu0 %v2635_v2 }
 0xd21   :  { %v2719_v50 = vunpack.i.h.bf16 %v2717_v1  ;;  %v2718_v4 = vunpack.i.l.bf16 %v2717_v1  ;;  %2638 = vmatpush3.bf16.msra.mxu0 %v2635_v2 }
 0xd22   :  { %v2639_v16 = vpack.c.bf16 %v2714_v25, %v2713_v27 }
 0xd23   :  { %v2643_v17 = vpack.c.bf16 %v2719_v50, %v2718_v4  ;;  %v2722_v18 = vpop.permute.xlu1 %2721 }
 0xd24   :  { %2640 = vmatprep.subr.bf16.mxu0 %v2639_v16  ;;  %v2724_v20 = vunpack.i.h.bf16 %v2722_v18  ;;  %v2723_v21 = vunpack.i.l.bf16 %v2722_v18  ;;  %v1833_v24 = vpop.permute.xlu0 %1832 }
 0xd25   :  { %2642 = vmatpush3.bf16.msra.mxu0 %v2639_v16 }
 0xd26   :  { %v2770_v55 = vpop.eup %2769  ;;  %v2647_v23 = vpack.c.bf16 %v2724_v20, %v2723_v21  ;;  %2644 = vmatprep.subr.bf16.mxu0 %v2643_v17 }
 0xd27   :  { %v2772_v5 = vpop.eup %2771  ;;  %v1814_v7 = vmul.f32 %v2770_v55, %v1798_v36 }
 0xd28   :  { %v1813_v14 = vmul.f32 %v2772_v5, %v1797_v37 }
 0xd29   :  { %v1822_v28 = vmul.f32 %v2337_v42, %v1814_v7  ;;  %2646 = vmatpush3.bf16.msra.mxu0 %v2643_v17 }
 0xd2a   :  { %v1821_v15 = vmul.f32 %v2337_v42, %v1813_v14  ;;  %2648 = vmatprep.subr.bf16.mxu0 %v2647_v23 }
 0xd2b   :  { %v1827_v22 = vadd.f32 %v1824_v61, %v1822_v28 }
 0xd2c   :  { %v1826_v8 = vadd.f32 %v1824_v61, %v1821_v15 }
 0xd2d   :  { %2650 = vmatpush3.bf16.msra.mxu0 %v2647_v23 }
 0xd2e   :  { %2557 = vmatprep.mubr.msk.f32.mxu1 %vm56_vm0, %v1826_v8 }
 0xd2f   :  { %2558 = vmatmul.mubr.msk.f32.vlgmr.msra.gmra.mrb[20].mxu1 %vm56_vm0, %v1827_v22 }
 0xd30   :  { %2587 = vmatprep.mubr.msk.f32.mxu1 %vm2857_vm1, %v2856_v19 }
 0xe02   :  { %v2559_v11 = vpop.f32.mrb[20].mxu1 }
 0xe03   :  { %v1913_v26 = vadd.f32 %v2559_v11, %v1833_v24  ;;  %v1907_v29 = vpop.f32.mrb[21].mxu1 }
 0xe04   :  { %v1908_v30 = vadd.f32 %v1907_v29, %v1833_v24 }
 0xe05   :  { %v1917_v13 = vmax.f32 %v1913_v26, 0.0 }
 0xe06   :  { %v1916_v31 = vmax.f32 %v1908_v30, 0.0 }
 0xe08   :  { %2576 = vmatprep.mubr.msk.f32.mxu0 %vm1965_vm5, %v1916_v31  ;;  %v2198_v31 = vld [vmem:[%s3187_s2 + $0x3] sm:$0x1]  ;;  %s2866_s2 = smov [#allocation7]  }
 0xe09   :  { %2577 = vmatmul.mubr.msk.f32.vlgmr.msra.gmra.mrb[20].mxu0 %vm1965_vm5, %v1917_v13  ;;  %v2865_v13 = vmov 0   ;;  %s2293_s26 = sshll.u32 %s2866_s2, 4  ;;  %s2294_s26 = int_to_ptr.vmem [resolvable:$true] %s2293_s26 }
 0xe0a   :  { %2735 = vset.pattern.permute.xlu1 %v2865_v13  ;;  %2736 = vset.pattern.permute.xlu0 %v2865_v13  ;;  %s2821_s27 = scalar_lea.vmem %s2294_s26, 16  ;;  %s2825_s28 = scalar_lea.vmem %s2294_s26, 32 }
 0xe0b   :  { %p2822_p2 = scmp.ne.s32.totalorder %s2294_s26, %s2821_s27  ;;  %p2826_p3 = scmp.lt.s32.totalorder %s2294_s26, %s2294_s26 }
 0xe0c   :  { %p2827_p4 = scmp.lt.s32.totalorder %s2825_s28, %s2821_s27 }
 0xe0e   :  { %p2828_p5 = por %p2827_p4, %p2826_p3 }
 0xe10   :  { %p2829_p6 = pnand %p2828_p5, %p2822_p2 }
 0xedc   :  { %v2578_v33 = vpop.f32.mrb[20].mxu0 }
 0xedd   :  { %v2044_v34 = vadd.f32 %v2578_v33, %v2340_v32  ;;  %v2038_v35 = vpop.f32.mrb[21].mxu0 }
 0xede   :  { %v2039_v36 = vadd.f32 %v2340_v32, %v2038_v35 }
 0xedf   :  { %v2048_v37 = vadd.f32 %v2044_v34, %v1827_v22 }
 0xee0   :  { %v2047_v38 = vadd.f32 %v2039_v36, %v1826_v8 }
 0xee1   :  { %v2052_v39 = vsel %vm56_vm0, %v2048_v37, 0.0 }
 0xee2   :  { %2053 = vadd.xlane.f32.xlu0 %v2052_v39  ;;  %v2049_v40 = vsel %vm56_vm0, %v2047_v38, 0.0 }
 0xee3   :  { %2050 = vadd.xlane.f32.xlu1 %v2049_v40 }
 0xf6f   :  { %v2054_v10 = vpop.xlane.xlu0 %2053 }
 0xf70   :  { %v2056_v6 = vmul.f32 0.03125, %v2054_v10  ;;  %v2051_v41 = vpop.xlane.xlu1 %2050 }
 0xf71   :  { %v2055_v42 = vmul.f32 0.03125, %v2051_v41 }
 0xf72   :  { %v2058_v43 = vsub.f32 %v2048_v37, %v2056_v6 }
 0xf73   :  { %v2057_v44 = vsub.f32 %v2047_v38, %v2055_v42  ;;  %v2204_v38 = vlaneseq }
 0xf74   :  { %v2060_v45 = vmul.f32 %v2058_v43, %v2058_v43 }
 0xf75   :  { %v2059_v46 = vmul.f32 %v2057_v44, %v2057_v44 }
 0xf76   :  { %v2064_v54 = vsel %vm56_vm0, %v2060_v45, 0.0 }
 0xf77   :  { %2065 = vadd.xlane.f32.xlu1 %v2064_v54  ;;  %v2061_v48 = vsel %vm56_vm0, %v2059_v46, 0.0 }
 0xf78   :  { %2062 = vadd.xlane.f32.xlu0 %v2061_v48 }
 0xf88   :  { %2080 = vrot.lane.b32.xlu1 %v2340_v32, %s2858_s14 }
 0xf8c   :  { %2726 = vrot.lane.b32.xlu1 %v3132_v47, %s2862_s18 }
 0xf8e   :  { %2075 = vrot.lane.b32.xlu0 %v2340_v32, %s2855_s13 }
 0xf90   :  { %2122 = vrot.lane.b32.xlu1 %v2340_v32, %s2862_s18 }
 0xf92   :  { %2731 = vrot.lane.b32.xlu0 %v3136_v49, %s2862_s18 }
 0xf94   :  { %2201 = vperm.xlu1 %2735, %v2198_v31  }
 0xf96   :  { %2208 = vrot.lane.b32.xlu0 %v2340_v32, %s2854_s9 }
0x1004   :  { %v2066_v51 = vpop.xlane.xlu1 %2065 }
0x1005   :  { %v2068_v9 = vmul.f32 0.03125, %v2066_v51  ;;  %v2063_v53 = vpop.xlane.xlu0 %2062 }
0x1006   :  { %v2067_v52 = vmul.f32 0.03125, %v2063_v53 }
0x1007   :  { %v2070_v56 = vadd.f32 1e-05, %v2068_v9 }
0x1008   :  { %v2069_v57 = vadd.f32 1e-05, %v2067_v52  ;;  %v2081_v58 = vpop.permute.xlu1 %2080 }
0x1009   :  { %2773 = vrsqrt.f32 %v2070_v56  ;;  %v2076_v47 = vpop.permute.xlu0 %2075 }
0x100a   :  { %2775 = vrsqrt.f32 %v2069_v57 }
0x100c   :  { %v2727_v59 = vpop.permute.xlu1 %2726 }
0x100d   :  { %v2729_v60 = vunpack.i.h.bf16 %v2727_v59  ;;  %v2728_v61 = vunpack.i.l.bf16 %v2727_v59  ;;  %v2732_v62 = vpop.permute.xlu0 %2731 }
0x100e   :  { %v2734_v63 = vunpack.i.h.bf16 %v2732_v62  ;;  %v2733_v49 = vunpack.i.l.bf16 %v2732_v62 }
0x100f   :  { %v2652_v0 = vpack.c.bf16 %v2729_v60, %v2728_v61 }
0x1010   :  { %v2655_v1 = vpack.c.bf16 %v2734_v63, %v2733_v49  ;;  %v2123_v32 = vpop.permute.xlu1 %2122 }
0x1011   :  { %2653 = vmatpush3.bf16.msra.mxu1 %v2652_v0  ;;  %v2209_v37 = vpop.permute.xlu0 %2208 }
0x1012   :  { %2654 = vmatprep.subr.bf16.mxu1 %v2864_v3 }
0x1013   :  { %v2774_v55 = vpop.eup %2773 }
0x1014   :  { %v2776_v2 = vpop.eup %2775  ;;  %v2074_v50 = vmul.f32 %v2774_v55, %v2058_v43  ;;  %v2202_v40 = vpop.permute.xlu1 %2201 }
0x1015   :  { %v2073_v4 = vmul.f32 %v2776_v2, %v2057_v44  ;;  %2656 = vmatpush3.bf16.msra.mxu1 %v2655_v1 }
0x1016   :  { %v2079_v5 = vmul.f32 %v2076_v47, %v2074_v50  ;;  %2590 = vmatprep.subr.mxu1 %v2856_v19 }
0x1017   :  { %v2078_v7 = vmul.f32 %v2076_v47, %v2073_v4 }
0x1018   :  { %v2084_v12 = vadd.f32 %v2081_v58, %v2079_v5 }
0x1019   :  { %v2083_v14 = vadd.f32 %v2081_v58, %v2078_v7 }
0x101a   :  { %v2092_v25 = vsel %vm56_vm0, %v2084_v12, 0.0 }
0x101b   :  { %v2085_v27 = vsel %vm56_vm0, %v2083_v14, 0.0  ;;  %v2093_v28 = vrot.slane %v2092_v25, 4 }
0x101c   :  { %v2086_v15 = vrot.slane %v2085_v27, 4 }
0x101d   :  { %v2094_v16 = vadd.f32 %v2093_v28, %v2092_v25 }
0x101e   :  { %v2087_v17 = vadd.f32 %v2086_v15, %v2085_v27 }
0x101f   :  { %v2095_v18 = vrot.slane %v2094_v16, 2 }
0x1020   :  { %v2088_v8 = vrot.slane %v2087_v17, 2 }
0x1021   :  { %v2096_v20 = vadd.f32 %v2095_v18, %v2094_v16 }
0x1022   :  { %v2089_v21 = vadd.f32 %v2088_v8, %v2087_v17 }
0x1023   :  { %v2097_v22 = vrot.slane %v2096_v20, 1 }
0x1024   :  { %v2090_v23 = vrot.slane %v2089_v21, 1 }
0x1025   :  { %v2098_v24 = vadd.f32 %v2097_v22, %v2096_v20 }
0x1026   :  { %v2091_v11 = vadd.f32 %v2090_v23, %v2089_v21 }
0x1027   :  { %v2101_v26 = vmul.f32 0.125, %v2098_v24 }
0x1028   :  { %v2100_v29 = vmul.f32 0.125, %v2091_v11 }
0x102a   :  { %v2105_v30 = vsel %vm2104_vm6, %v2101_v26, %v2100_v29 }
0x102b   :  { %2588 = vmatmul.mubr.msk.f32.vlgmr.msra.gmra.mrb[22].mxu1 %vm56_vm0, %v2105_v30 }
0x102c   :  { %2592 = vmatprep.mubr.msk.f32.mxu1 %vm2857_vm1, %v2856_v19  ;;  %v2205_v19 = vshrl.u32 %v2204_v38, 7 }
0x102e   :  { %v2206_v39 = vsub.s32 0, %v2205_v19 }
0x1030   :  { %v2207_v10 = vrot.slane %v2202_v40, %v2206_v39 }
0x10fe   :  { %v2193_v33 = vpop.f32.mrb[22].mxu1 }
0x10ff   :  { %v2194_v34 = vadd.f32 %v2193_v33, %v2123_v32  ;;  %v2589_v35 = vpop.f32.mrb[23].mxu1 }
0x1101   :  { %v2197_v36 = vmax.f32 %v2194_v34, 0.0 }
0x1103   :  { %2591 = vmatpush3.xpose.msk.msra.mxu1 %vm1669_vm4, %v2197_v36 }
0x1106   :  { %2593 = vmatmul.mubr.msk.f32.vlgmr.msra.gmra.mrb[24].mxu1 %vm1669_vm4, %v2209_v37 }
0x11d9   :  { %v2281_v6 = vpop.f32.mrb[24].mxu1 }
0x11da   :  { %v2282_v41 = vadd.f32 %v2281_v6, %v2207_v10  ;;  %v2594_v42 = vpop.f32.mrb[25].mxu1 }
0x11dc   :  { %2286 = vst.msk [vmem:[#allocation7] sm:$0x1] %vm2285_vm7, %v2282_v41 }
0x11dd   :  { %2832 = shalt.err (!%p2829_p6)
}
0x11de   :  { %s2833_s4 = scalar_lea.hbm %s3188_s3, 16 }
0x11df   :  { %p2834_p7 = scmp.ne.s32.totalorder %s3188_s3, %s2833_s4  ;;  %p2837_p8 = scmp.lt.u32.totalorder %s2833_s4, %s3188_s3 }
0x11e1   :  { %p2839_p9 = pnand %p2837_p8, %p2834_p7 }
0x11e3   :  { %2842 = shalt.err (!%p2839_p9)
}
0x11e4   :  { %2296 = dma.vmem_to_hbm [thread:$0]  %s2294_s26, 16, %s3188_s3, [#allocation4]  }
0x11e5   :  { %2847 = dma.done.wait [#allocation4], 16  }
0x11e6   :  { %2848 = vsyncadd [#allocation4], 4294967280 }
0x11e7   :  { %2300 = vsyncpa [#allocation3], 1 }
0x11e8   :  { %2301 = vsyncpa [#allocation6], 1 }
0x11e9   :  { %2302 = vsyncpa [#allocation4], 1 }

</bundles_post_ra>
